<compile_context>
chip_gen: v7x
topology: tpu7x:2x2x1
jax: 0.10.0
libtpu: 0.0.40
codegen_flags: <defaults>
</compile_context>

<pallas_src>
import functools

import jax
import jax.numpy as jnp
from jax.experimental import pallas as pl
from jax.experimental.pallas import tpu as pltpu

EPS = 1e-5
COL0 = 8          # sublane-aligned column offset of the scratch interior


# ---------------------------------------------------------------------------
# Fused Bottleneck kernel (one spatial row-tile per grid step)
# ---------------------------------------------------------------------------
def _bottleneck_kernel(x_ref, ht_ref, hb_ref, w1_ref, b1_ref, w2_ref, b2_ref,
                       w3_ref, b3_ref, o_ref, out1_buf, out2_buf):
    """Fused Bottleneck forward for one (1, TH, W, C) spatial tile.

    x_ref    : (1, TH, W, C)      input tile (C == 4*planes), also the residual
    ht_ref   : (1, 1, W, C)       image row just above this tile (clamped)
    hb_ref   : (1, 1, W, C)       image row just below this tile (clamped)
    w1_ref   : (C, P)   bf16      1x1 conv1 weights, BN1 folded, P padded
    b1_ref   : (1, P)   f32       folded BN1 bias (zero in padded lanes)
    w2_ref   : (9, P, P) bf16     3x3 conv2 weights (tap-major), BN2 folded
    b2_ref   : (1, P)   f32
    w3_ref   : (P, C)   bf16      1x1 conv3 weights, BN3 folded
    b3_ref   : (1, C)   f32
    o_ref    : (1, TH, W, C)      output tile
    out1_buf : (TH+2, W+16, P) bf16  conv1 output incl. conv2 zero padding;
                                      interior at columns [COL0, COL0+W)
    out2_buf : (TH*W, P) f32      conv2 accumulator scratch
    """
    i = pl.program_id(1)
    nt = pl.num_programs(1)
    _, TH, W, C = x_ref.shape
    P = w1_ref.shape[1]

    w1 = w1_ref[...]
    b1 = b1_ref[...]

    # --- zero only conv2's zero-pad columns (aligned 8-wide chunks) ---------
    out1_buf[:, 0:COL0, :] = jnp.zeros((TH + 2, COL0, P), out1_buf.dtype)
    out1_buf[:, COL0 + W:COL0 + W + 8, :] = jnp.zeros((TH + 2, 8, P),
                                                      out1_buf.dtype)

    # --- conv1 + bn1 + relu on the tile's own rows (bf16 MXU, f32 acc) ------
    x_bf = x_ref[...].reshape(TH * W, C).astype(jnp.bfloat16)
    o1 = jnp.dot(x_bf, w1, preferred_element_type=jnp.float32) + b1
    out1_buf[1:TH + 1, COL0:COL0 + W, :] = (
        jnp.maximum(o1, 0.0).reshape(TH, W, P).astype(out1_buf.dtype))

    # --- conv1 on the halo rows (zeros at the image borders) ----------------
    @pl.when(i == 0)
    def _():
        out1_buf[0:1, COL0:COL0 + W, :] = jnp.zeros((1, W, P), out1_buf.dtype)

    @pl.when(i > 0)
    def _():
        r = jnp.dot(ht_ref[...].reshape(W, C).astype(jnp.bfloat16), w1,
                    preferred_element_type=jnp.float32) + b1
        out1_buf[0:1, COL0:COL0 + W, :] = (
            jnp.maximum(r, 0.0).reshape(1, W, P).astype(out1_buf.dtype))

    @pl.when(i == nt - 1)
    def _():
        out1_buf[TH + 1:TH + 2, COL0:COL0 + W, :] = jnp.zeros(
            (1, W, P), out1_buf.dtype)

    @pl.when(i < nt - 1)
    def _():
        r = jnp.dot(hb_ref[...].reshape(W, C).astype(jnp.bfloat16), w1,
                    preferred_element_type=jnp.float32) + b1
        out1_buf[TH + 1:TH + 2, COL0:COL0 + W, :] = (
            jnp.maximum(r, 0.0).reshape(1, W, P).astype(out1_buf.dtype))

    # --- conv2 (3x3, pad=1) + bn2 + relu: 9 shifted VMEM taps ----------------
    # Accumulate into a VMEM scratch so tap live-ranges stay bounded.
    for t in range(9):
        dy, dx = divmod(t, 3)
        tap = out1_buf[dy:dy + TH,
                       COL0 - 1 + dx:COL0 - 1 + dx + W, :].reshape(TH * W, P)
        contrib = jnp.dot(tap, w2_ref[t], preferred_element_type=jnp.float32)
        if t == 0:
            out2_buf[...] = contrib
        else:
            out2_buf[...] += contrib
    o2 = jnp.maximum(out2_buf[...] + b2_ref[...], 0.0).astype(jnp.bfloat16)

    # --- conv3 (1x1) + bn3 + residual + relu ---------------------------------
    o3 = jnp.dot(o2, w3_ref[...], preferred_element_type=jnp.float32) + b3_ref[...]
    o3 = jnp.maximum(o3 + x_ref[...].reshape(TH * W, C), 0.0)
    o_ref[...] = o3.reshape(1, TH, W, C).astype(o_ref.dtype)


# ---------------------------------------------------------------------------
# Wrapper helpers
# ---------------------------------------------------------------------------
def _fold_bn(gamma, beta, mean, var):
    scale = gamma / jnp.sqrt(var + EPS)
    bias = beta - mean * scale
    return scale, bias


def _round_up(x, m):
    return ((x + m - 1) // m) * m


def _vmem_capacity():
    try:
        return int(pltpu.get_tpu_info().vmem_capacity_bytes)
    except Exception:
        return 64 << 20        # conservative (v7x per-TC) fallback


def _vmem_estimate(TH, W, C, P_pad):
    f32, bf16 = 4, 2
    est = 0
    est += 2 * 2 * TH * W * C * f32                                  # x + out tiles (x2 buffers)
    est += 2 * 2 * W * C * f32                                       # halo rows (x2 buffers)
    est += 2 * (C * P_pad + 9 * P_pad * P_pad + P_pad * C) * bf16    # weights (x2 buffers)
    est += 2 * (2 * P_pad + C) * f32                                 # biases (x2 buffers)
    est += (TH + 2) * (W + 2 * COL0) * P_pad * bf16                  # out1 scratch
    est += TH * W * P_pad * f32                                      # out2 accumulator
    est += 2 * TH * W * max(P_pad, C) * f32                          # live vregs / relayouts
    return int(est * 1.2) + (2 << 20)


def _pick_block_rows(N, H, W, C, P_pad):
    """Largest divisor of H whose resident working set fits the VMEM budget."""
    budget = int(_vmem_capacity() * 0.6)
    feasible = [th for th in range(1, H + 1)
                if H % th == 0 and _vmem_estimate(th, W, C, P_pad) <= budget]
    if not feasible:
        return 1
    best = max(feasible)
    if N == 1:
        # Prefer >=2 row tiles so the megacore (v7x) parallel grid has work.
        multi = [th for th in feasible if H // th >= 2]
        if multi:
            best = max(multi)
    return best


def _prep_weights(p, C, planes, P_pad):
    s1, b1 = _fold_bn(p["g1"], p["b1"], p["m1"], p["v1"])
    s2, b2 = _fold_bn(p["g2"], p["b2"], p["m2"], p["v2"])
    s3, b3 = _fold_bn(p["g3"], p["b3"], p["m3"], p["v3"])

    w1 = p["w1"][:, :, 0, 0].T * s1[None, :]                              # (C, P)
    w2 = jnp.transpose(p["w2"], (2, 3, 1, 0)).reshape(9, planes, planes)  # (9, Pin, Pout)
    w2 = w2 * s2[None, None, :]
    w3 = p["w3"][:, :, 0, 0].T * s3[None, :]                              # (P, C)

    padP = P_pad - planes
    w1 = jnp.pad(w1, ((0, 0), (0, padP))).astype(jnp.bfloat16)
    w2 = jnp.pad(w2, ((0, 0), (0, padP), (0, padP))).astype(jnp.bfloat16)
    w3 = jnp.pad(w3, ((0, padP), (0, 0))).astype(jnp.bfloat16)
    b1 = jnp.pad(b1, (0, padP)).reshape(1, P_pad).astype(jnp.float32)
    b2 = jnp.pad(b2, (0, padP)).reshape(1, P_pad).astype(jnp.float32)
    b3 = b3.reshape(1, C).astype(jnp.float32)
    return w1, b1, w2, b2, w3, b3


# ---------------------------------------------------------------------------
# NHWC entry point (use this inside a channels-last network)
# ---------------------------------------------------------------------------
def bottleneck_forward_nhwc(x, params, block_rows=None):
    N, H, W, C = x.shape
    planes = params["w1"].shape[0]
    if C != 4 * planes:
        raise ValueError("Fused kernel implements the stride=1 / dilate=1 / "
                         "downsample=None Bottleneck: requires inplanes == 4*planes.")

    P_pad = _round_up(planes, 128)
    TH = block_rows if block_rows is not None else _pick_block_rows(N, H, W, C, P_pad)
    if H % TH != 0:
        raise ValueError(f"block_rows={TH} must divide H={H}")
    nt = H // TH

    w1, b1, w2, b2, w3, b3 = _prep_weights(params, C, planes, P_pad)

    cap = _vmem_capacity()
    vmem_limit = min(int(cap * 0.75), 100 << 20)

    # Halo rows fetched directly from x (no jnp.pad HBM round trip); clamped
    # indices at the image borders are never read (masked by pl.when).
    top_map = lambda n, i: (n, jnp.maximum(i * TH - 1, 0), 0, 0)
    bot_map = lambda n, i: (n, jnp.minimum((i + 1) * TH, H - 1), 0, 0)

    out = pl.pallas_call(
        _bottleneck_kernel,
        out_shape=jax.ShapeDtypeStruct((N, H, W, C), x.dtype),
        grid_spec=pltpu.PrefetchScalarGridSpec(
            num_scalar_prefetch=0,
            grid=(N, nt),
            in_specs=[
                pl.BlockSpec((1, TH, W, C), lambda n, i: (n, i, 0, 0)),
                pl.BlockSpec((1, 1, W, C), top_map),
                pl.BlockSpec((1, 1, W, C), bot_map),
                pl.BlockSpec((C, P_pad), lambda n, i: (0, 0)),
                pl.BlockSpec((1, P_pad), lambda n, i: (0, 0)),
                pl.BlockSpec((9, P_pad, P_pad), lambda n, i: (0, 0, 0)),
                pl.BlockSpec((1, P_pad), lambda n, i: (0, 0)),
                pl.BlockSpec((P_pad, C), lambda n, i: (0, 0)),
                pl.BlockSpec((1, C), lambda n, i: (0, 0)),
            ],
            out_specs=pl.BlockSpec((1, TH, W, C), lambda n, i: (n, i, 0, 0)),
            scratch_shapes=[
                pltpu.VMEM((TH + 2, W + 2 * COL0, P_pad), jnp.bfloat16),
                pltpu.VMEM((TH * W, P_pad), jnp.float32),
            ]),
        compiler_params=pltpu.CompilerParams(
            dimension_semantics=("parallel", "parallel"),
            vmem_limit_bytes=vmem_limit),
    )(x, x, x, w1, b1, w2, b2, w3, b3)
    return out


# ---------------------------------------------------------------------------
# PyTorch-layout (NCHW) wrapper — transposes only at the module boundary.
# ---------------------------------------------------------------------------
@functools.partial(jax.jit, static_argnames=("block_rows",))
def bottleneck_forward(x_nchw, params, block_rows=None):
    x = jnp.transpose(x_nchw, (0, 2, 3, 1))          # NCHW -> NHWC
    out = bottleneck_forward_nhwc(x, params, block_rows=block_rows)
    return jnp.transpose(out, (0, 3, 1, 2))          # NHWC -> NCHW


# ---------------------------------------------------------------------------
# Pure-JAX references (for verification)
# ---------------------------------------------------------------------------
def reference_forward(x, p):
    """Full-f32, highest-precision reference (PyTorch-equivalent semantics)."""
    def conv(x, w, pad=0):
        return jax.lax.conv_general_dilated(
            x, w, (1, 1), [(pad, pad), (pad, pad)],
            dimension_numbers=("NCHW", "OIHW", "NCHW"),
            precision=jax.lax.Precision.HIGHEST)

    def bn(x, g, b, m, v):
        sh = (1, -1, 1, 1)
        return (x - m.reshape(sh)) / jnp.sqrt(v.reshape(sh) + EPS) * g.reshape(sh) + b.reshape(sh)

    out = jax.nn.relu(bn(conv(x, p["w1"]), p["g1"], p["b1"], p["m1"], p["v1"]))
    out = jax.nn.relu(bn(conv(out, p["w2"], pad=1), p["g2"], p["b2"], p["m2"], p["v2"]))
    out = bn(conv(out, p["w3"]), p["g3"], p["b3"], p["m3"], p["v3"])
    return jax.nn.relu(out + x)


def reference_forward_bf16(x, p):
    """Reference that matches the kernel's bf16-operand / f32-accum numerics."""
    def conv_bf16(inp, w_oihw, g, b, m, v, pad):
        s, bias = _fold_bn(g, b, m, v)
        w = (w_oihw * s[:, None, None, None]).astype(jnp.bfloat16)
        o = jax.lax.conv_general_dilated(
            inp.astype(jnp.bfloat16), w, (1, 1), [(pad, pad), (pad, pad)],
            dimension_numbers=("NCHW", "OIHW", "NCHW"),
            preferred_element_type=jnp.float32)
        return o + bias[None, :, None, None]

    o = jax.nn.relu(conv_bf16(x, p["w1"], p["g1"], p["b1"], p["m1"], p["v1"], 0))
    o = jax.nn.relu(conv_bf16(o, p["w2"], p["g2"], p["b2"], p["m2"], p["v2"], 1))
    o = conv_bf16(o, p["w3"], p["g3"], p["b3"], p["m3"], p["v3"], 0)
    return jax.nn.relu(o + x)


# ---------------------------------------------------------------------------
def make_params(key, inplanes, planes):
    ks = jax.random.split(key, 8)

    def bn_p(k, c):
        k1, k2, k3, k4 = jax.random.split(k, 4)
        g = jax.random.uniform(k1, (c,), jnp.float32, 0.5, 1.5)
        b = jax.random.normal(k2, (c,), jnp.float32) * 0.1
        m = jax.random.normal(k3, (c,), jnp.float32) * 0.1
        v = jax.random.uniform(k4, (c,), jnp.float32, 0.5, 1.5)
        return g, b, m, v

    p = {}
    p["w1"] = jax.random.normal(ks[0], (planes, inplanes, 1, 1), jnp.float32) * 0.1
    p["w2"] = jax.random.normal(ks[1], (planes, planes, 3, 3), jnp.float32) * 0.1
    p["w3"] = jax.random.normal(ks[2], (planes * 4, planes, 1, 1), jnp.float32) * 0.1
    p["g1"], p["b1"], p["m1"], p["v1"] = bn_p(ks[3], planes)
    p["g2"], p["b2"], p["m2"], p["v2"] = bn_p(ks[4], planes)
    p["g3"], p["b3"], p["m3"], p["v3"] = bn_p(ks[5], planes * 4)
    return p, ks[6]


if __name__ == "__main__":
    planes = 4
    inplanes = planes * 4          # required when downsample is None
    N, H, W = 2, 16, 16

    params, xkey = make_params(jax.random.PRNGKey(0), inplanes, planes)
    x = jax.random.normal(xkey, (N, inplanes, H, W), jnp.float32)

    ref_f32 = reference_forward(x, params)
    ref_bf16 = reference_forward_bf16(x, params)

    # Explicit small row tile -> 2 tiles per image, exercises the halo path.
    out_tiled = jax.block_until_ready(bottleneck_forward(x, params, block_rows=8))
    # Auto-selected tile size (single tile per image at this toy size).
    out_auto = jax.block_until_ready(bottleneck_forward(x, params))

    for out in (out_tiled, out_auto):
        assert out.shape == (N, inplanes, H, W), out.shape
        # Tight check vs. a reference with identical bf16-operand numerics.
        err_b = float(jnp.max(jnp.abs(out - ref_bf16)))
        assert jnp.allclose(out, ref_bf16, rtol=5e-3, atol=5e-3), err_b
        # Looser sanity check vs. the full-f32 PyTorch-equivalent reference.
        err_f = float(jnp.max(jnp.abs(out - ref_f32)))
        assert jnp.allclose(out, ref_f32, rtol=1e-1, atol=1e-1), err_f

    print("KERNEL_OK")
</pallas_src>

<mosaic_0001>
module attributes {stable_mosaic.version = 11 : i64} {
  func.func @_bottleneck_kernel(%arg0: i32, %arg1: i32, %arg2: memref<1x8x16x16xf32, #tpu.memory_space<vmem>>, %arg3: memref<1x1x16x16xf32, #tpu.memory_space<vmem>>, %arg4: memref<1x1x16x16xf32, #tpu.memory_space<vmem>>, %arg5: memref<16x128xbf16, #tpu.memory_space<vmem>>, %arg6: memref<1x128xf32, #tpu.memory_space<vmem>>, %arg7: memref<9x128x128xbf16, #tpu.memory_space<vmem>>, %arg8: memref<1x128xf32, #tpu.memory_space<vmem>>, %arg9: memref<128x16xbf16, #tpu.memory_space<vmem>>, %arg10: memref<1x16xf32, #tpu.memory_space<vmem>>, %arg11: memref<1x8x16x16xf32, #tpu.memory_space<vmem>>, %arg12: memref<10x32x128xbf16, #tpu.memory_space<vmem>>, %arg13: memref<128x128xf32, #tpu.memory_space<vmem>>) attributes {dimension_semantics = [#tpu.dimension_semantics<parallel>, #tpu.dimension_semantics<parallel>], iteration_bounds = array<i64: 2, 2>, scalar_prefetch = 0 : i64, scratch_operands = 2 : i64, tpu.core_type = #tpu.core_type<tc>, window_params = [{transform_indices = @transform_0, window_bounds = array<i64: 1, 8, 16, 16>}, {transform_indices = @transform_1, window_bounds = array<i64: 1, 1, 16, 16>}, {transform_indices = @transform_2, window_bounds = array<i64: 1, 1, 16, 16>}, {pipeline_mode = #tpu.pipeline_mode<synchronous>, transform_indices = @transform_3, window_bounds = array<i64: 16, 128>}, {pipeline_mode = #tpu.pipeline_mode<synchronous>, transform_indices = @transform_4, window_bounds = array<i64: 1, 128>}, {pipeline_mode = #tpu.pipeline_mode<synchronous>, transform_indices = @transform_5, window_bounds = array<i64: 9, 128, 128>}, {pipeline_mode = #tpu.pipeline_mode<synchronous>, transform_indices = @transform_6, window_bounds = array<i64: 1, 128>}, {pipeline_mode = #tpu.pipeline_mode<synchronous>, transform_indices = @transform_7, window_bounds = array<i64: 128, 16>}, {pipeline_mode = #tpu.pipeline_mode<synchronous>, transform_indices = @transform_8, window_bounds = array<i64: 1, 16>}, {transform_indices = @transform_9, window_bounds = array<i64: 1, 8, 16, 16>}]} {
    %c0 = arith.constant 0 : index
    %c0_0 = arith.constant 0 : index
    %0 = vector.load %arg5[%c0, %c0_0] : memref<16x128xbf16, #tpu.memory_space<vmem>>, vector<16x128xbf16>
    %c0_1 = arith.constant 0 : index
    %c0_2 = arith.constant 0 : index
    %1 = vector.load %arg6[%c0_1, %c0_2] : memref<1x128xf32, #tpu.memory_space<vmem>>, vector<1x128xf32>
    %cst = arith.constant 0.000000e+00 : bf16
    %2 = vector.broadcast %cst : bf16 to vector<10x8x128xbf16>
    %c0_3 = arith.constant 0 : index
    %c0_4 = arith.constant 0 : index
    %c0_5 = arith.constant 0 : index
    %3 = vector.load %arg12[%c0_3, %c0_4, %c0_5] : memref<10x32x128xbf16, #tpu.memory_space<vmem>>, vector<10x8x128xbf16>
    tpu.vector_store %arg12[%c0_3, %c0_4, %c0_5], %2 {strides = array<i32>} : memref<10x32x128xbf16, #tpu.memory_space<vmem>>, vector<10x8x128xbf16>,
    %cst_6 = arith.constant 0.000000e+00 : bf16
    %4 = vector.broadcast %cst_6 : bf16 to vector<10x8x128xbf16>
    %c0_7 = arith.constant 0 : index
    %c24 = arith.constant 24 : index
    %c0_8 = arith.constant 0 : index
    %5 = vector.load %arg12[%c0_7, %c24, %c0_8] : memref<10x32x128xbf16, #tpu.memory_space<vmem>>, vector<10x8x128xbf16>
    tpu.vector_store %arg12[%c0_7, %c24, %c0_8], %4 {strides = array<i32>} : memref<10x32x128xbf16, #tpu.memory_space<vmem>>, vector<10x8x128xbf16>,
    %c0_9 = arith.constant 0 : index
    %c0_10 = arith.constant 0 : index
    %c0_11 = arith.constant 0 : index
    %c0_12 = arith.constant 0 : index
    %6 = vector.load %arg2[%c0_9, %c0_10, %c0_11, %c0_12] : memref<1x8x16x16xf32, #tpu.memory_space<vmem>>, vector<1x8x16x16xf32>
    %7 = vector.shape_cast %6 : vector<1x8x16x16xf32> to vector<128x16xf32>
    %8 = arith.truncf %7 : vector<128x16xf32> to vector<128x16xbf16>
    %cst_13 = arith.constant dense<0.000000e+00> : vector<128x128xf32>
    %9 = tpu.matmul %8, %0, %cst_13 {dimension_numbers = #tpu.dot_dimension_numbers<[1], [0], [0], [1], [0, 0, 1, 1], [], []>} : vector<128x16xbf16>, vector<16x128xbf16>, vector<128x128xf32> -> vector<128x128xf32>
    %10 = vector.broadcast %1 : vector<1x128xf32> to vector<128x128xf32>
    %11 = arith.addf %9, %10 : vector<128x128xf32>
    %cst_14 = arith.constant 0.000000e+00 : f32
    %12 = vector.broadcast %cst_14 : f32 to vector<128x128xf32>
    %13 = arith.maximumf %11, %12 : vector<128x128xf32>
    %14 = vector.shape_cast %13 : vector<128x128xf32> to vector<8x16x128xf32>
    %15 = arith.truncf %14 : vector<8x16x128xf32> to vector<8x16x128xbf16>
    %c1 = arith.constant 1 : index
    %c8 = arith.constant 8 : index
    %c0_15 = arith.constant 0 : index
    %16 = vector.load %arg12[%c1, %c8, %c0_15] : memref<10x32x128xbf16, #tpu.memory_space<vmem>>, vector<8x16x128xbf16>
    tpu.vector_store %arg12[%c1, %c8, %c0_15], %15 {strides = array<i32>} : memref<10x32x128xbf16, #tpu.memory_space<vmem>>, vector<8x16x128xbf16>,
    %c0_i32 = arith.constant 0 : i32
    %17 = arith.cmpi eq, %arg1, %c0_i32 : i32
    %18 = arith.extui %17 : i1 to i32
    %c0_i32_16 = arith.constant 0 : i32
    %19 = arith.cmpi ne, %18, %c0_i32_16 : i32
    scf.if %19 {
      %cst_131 = arith.constant 0.000000e+00 : bf16
      %118 = vector.broadcast %cst_131 : bf16 to vector<1x16x128xbf16>
      %c0_132 = arith.constant 0 : index
      %c8_133 = arith.constant 8 : index
      %c0_134 = arith.constant 0 : index
      %119 = vector.load %arg12[%c0_132, %c8_133, %c0_134] : memref<10x32x128xbf16, #tpu.memory_space<vmem>>, vector<1x16x128xbf16>
      tpu.vector_store %arg12[%c0_132, %c8_133, %c0_134], %118 {strides = array<i32>} : memref<10x32x128xbf16, #tpu.memory_space<vmem>>, vector<1x16x128xbf16>,
    } else {
    }
    %c0_i32_17 = arith.constant 0 : i32
    %20 = arith.cmpi sgt, %arg1, %c0_i32_17 : i32
    %21 = arith.extui %20 : i1 to i32
    %c0_i32_18 = arith.constant 0 : i32
    %22 = arith.cmpi ne, %21, %c0_i32_18 : i32
    scf.if %22 {
      %c0_131 = arith.constant 0 : index
      %c0_132 = arith.constant 0 : index
      %c0_133 = arith.constant 0 : index
      %c0_134 = arith.constant 0 : index
      %118 = vector.load %arg3[%c0_131, %c0_132, %c0_133, %c0_134] : memref<1x1x16x16xf32, #tpu.memory_space<vmem>>, vector<1x1x16x16xf32>
      %119 = vector.shape_cast %118 : vector<1x1x16x16xf32> to vector<16x16xf32>
      %120 = arith.truncf %119 : vector<16x16xf32> to vector<16x16xbf16>
      %cst_135 = arith.constant dense<0.000000e+00> : vector<16x128xf32>
      %121 = tpu.matmul %120, %0, %cst_135 {dimension_numbers = #tpu.dot_dimension_numbers<[1], [0], [0], [1], [0, 0, 1, 1], [], []>} : vector<16x16xbf16>, vector<16x128xbf16>, vector<16x128xf32> -> vector<16x128xf32>
      %122 = vector.broadcast %1 : vector<1x128xf32> to vector<16x128xf32>
      %123 = arith.addf %121, %122 : vector<16x128xf32>
      %cst_136 = arith.constant 0.000000e+00 : f32
      %124 = vector.broadcast %cst_136 : f32 to vector<16x128xf32>
      %125 = arith.maximumf %123, %124 : vector<16x128xf32>
      %126 = vector.shape_cast %125 : vector<16x128xf32> to vector<1x16x128xf32>
      %127 = arith.truncf %126 : vector<1x16x128xf32> to vector<1x16x128xbf16>
      %c0_137 = arith.constant 0 : index
      %c8_138 = arith.constant 8 : index
      %c0_139 = arith.constant 0 : index
      %128 = vector.load %arg12[%c0_137, %c8_138, %c0_139] : memref<10x32x128xbf16, #tpu.memory_space<vmem>>, vector<1x16x128xbf16>
      tpu.vector_store %arg12[%c0_137, %c8_138, %c0_139], %127 {strides = array<i32>} : memref<10x32x128xbf16, #tpu.memory_space<vmem>>, vector<1x16x128xbf16>,
    } else {
    }
    %c1_i32 = arith.constant 1 : i32
    %23 = arith.cmpi eq, %arg1, %c1_i32 : i32
    %24 = arith.extui %23 : i1 to i32
    %c0_i32_19 = arith.constant 0 : i32
    %25 = arith.cmpi ne, %24, %c0_i32_19 : i32
    scf.if %25 {
      %cst_131 = arith.constant 0.000000e+00 : bf16
      %118 = vector.broadcast %cst_131 : bf16 to vector<1x16x128xbf16>
      %c9_132 = arith.constant 9 : index
      %c8_133 = arith.constant 8 : index
      %c0_134 = arith.constant 0 : index
      %119 = vector.load %arg12[%c9_132, %c8_133, %c0_134] : memref<10x32x128xbf16, #tpu.memory_space<vmem>>, vector<1x16x128xbf16>
      tpu.vector_store %arg12[%c9_132, %c8_133, %c0_134], %118 {strides = array<i32>} : memref<10x32x128xbf16, #tpu.memory_space<vmem>>, vector<1x16x128xbf16>,
    } else {
    }
    %c1_i32_20 = arith.constant 1 : i32
    %26 = arith.cmpi slt, %arg1, %c1_i32_20 : i32
    %27 = arith.extui %26 : i1 to i32
    %c0_i32_21 = arith.constant 0 : i32
    %28 = arith.cmpi ne, %27, %c0_i32_21 : i32
    scf.if %28 {
      %c0_131 = arith.constant 0 : index
      %c0_132 = arith.constant 0 : index
      %c0_133 = arith.constant 0 : index
      %c0_134 = arith.constant 0 : index
      %118 = vector.load %arg4[%c0_131, %c0_132, %c0_133, %c0_134] : memref<1x1x16x16xf32, #tpu.memory_space<vmem>>, vector<1x1x16x16xf32>
      %119 = vector.shape_cast %118 : vector<1x1x16x16xf32> to vector<16x16xf32>
      %120 = arith.truncf %119 : vector<16x16xf32> to vector<16x16xbf16>
      %cst_135 = arith.constant dense<0.000000e+00> : vector<16x128xf32>
      %121 = tpu.matmul %120, %0, %cst_135 {dimension_numbers = #tpu.dot_dimension_numbers<[1], [0], [0], [1], [0, 0, 1, 1], [], []>} : vector<16x16xbf16>, vector<16x128xbf16>, vector<16x128xf32> -> vector<16x128xf32>
      %122 = vector.broadcast %1 : vector<1x128xf32> to vector<16x128xf32>
      %123 = arith.addf %121, %122 : vector<16x128xf32>
      %cst_136 = arith.constant 0.000000e+00 : f32
      %124 = vector.broadcast %cst_136 : f32 to vector<16x128xf32>
      %125 = arith.maximumf %123, %124 : vector<16x128xf32>
      %126 = vector.shape_cast %125 : vector<16x128xf32> to vector<1x16x128xf32>
      %127 = arith.truncf %126 : vector<1x16x128xf32> to vector<1x16x128xbf16>
      %c9_137 = arith.constant 9 : index
      %c8_138 = arith.constant 8 : index
      %c0_139 = arith.constant 0 : index
      %128 = vector.load %arg12[%c9_137, %c8_138, %c0_139] : memref<10x32x128xbf16, #tpu.memory_space<vmem>>, vector<1x16x128xbf16>
      tpu.vector_store %arg12[%c9_137, %c8_138, %c0_139], %127 {strides = array<i32>} : memref<10x32x128xbf16, #tpu.memory_space<vmem>>, vector<1x16x128xbf16>,
    } else {
    }
    %c0_22 = arith.constant 0 : index
    %c7 = arith.constant 7 : index
    %c0_23 = arith.constant 0 : index
    %29 = vector.load %arg12[%c0_22, %c7, %c0_23] : memref<10x32x128xbf16, #tpu.memory_space<vmem>>, vector<8x16x128xbf16>
    %30 = vector.shape_cast %29 : vector<8x16x128xbf16> to vector<128x128xbf16>
    %c0_24 = arith.constant 0 : index
    %c0_25 = arith.constant 0 : index
    %c0_26 = arith.constant 0 : index
    %31 = vector.load %arg7[%c0_24, %c0_25, %c0_26] : memref<9x128x128xbf16, #tpu.memory_space<vmem>>, vector<1x128x128xbf16>
    %32 = vector.shape_cast %31 : vector<1x128x128xbf16> to vector<128x128xbf16>
    %cst_27 = arith.constant dense<0.000000e+00> : vector<128x128xf32>
    %33 = tpu.matmul %30, %32, %cst_27 {dimension_numbers = #tpu.dot_dimension_numbers<[1], [0], [0], [1], [0, 0, 1, 1], [], []>} : vector<128x128xbf16>, vector<128x128xbf16>, vector<128x128xf32> -> vector<128x128xf32>
    %c0_28 = arith.constant 0 : index
    %c0_29 = arith.constant 0 : index
    %34 = vector.load %arg13[%c0_28, %c0_29] : memref<128x128xf32, #tpu.memory_space<vmem>>, vector<128x128xf32>
    tpu.vector_store %arg13[%c0_28, %c0_29], %33 {strides = array<i32>} : memref<128x128xf32, #tpu.memory_space<vmem>>, vector<128x128xf32>,
    %c0_30 = arith.constant 0 : index
    %c8_31 = arith.constant 8 : index
    %c0_32 = arith.constant 0 : index
    %35 = vector.load %arg12[%c0_30, %c8_31, %c0_32] : memref<10x32x128xbf16, #tpu.memory_space<vmem>>, vector<8x16x128xbf16>
    %36 = vector.shape_cast %35 : vector<8x16x128xbf16> to vector<128x128xbf16>
    %c1_33 = arith.constant 1 : index
    %c0_34 = arith.constant 0 : index
    %c0_35 = arith.constant 0 : index
    %37 = vector.load %arg7[%c1_33, %c0_34, %c0_35] : memref<9x128x128xbf16, #tpu.memory_space<vmem>>, vector<1x128x128xbf16>
    %38 = vector.shape_cast %37 : vector<1x128x128xbf16> to vector<128x128xbf16>
    %cst_36 = arith.constant dense<0.000000e+00> : vector<128x128xf32>
    %39 = tpu.matmul %36, %38, %cst_36 {dimension_numbers = #tpu.dot_dimension_numbers<[1], [0], [0], [1], [0, 0, 1, 1], [], []>} : vector<128x128xbf16>, vector<128x128xbf16>, vector<128x128xf32> -> vector<128x128xf32>
    %c0_37 = arith.constant 0 : index
    %c0_38 = arith.constant 0 : index
    %40 = vector.load %arg13[%c0_37, %c0_38] : memref<128x128xf32, #tpu.memory_space<vmem>>, vector<128x128xf32>
    %41 = arith.addf %40, %39 : vector<128x128xf32>
    %c0_39 = arith.constant 0 : index
    %c0_40 = arith.constant 0 : index
    %42 = vector.load %arg13[%c0_39, %c0_40] : memref<128x128xf32, #tpu.memory_space<vmem>>, vector<128x128xf32>
    tpu.vector_store %arg13[%c0_39, %c0_40], %41 {strides = array<i32>} : memref<128x128xf32, #tpu.memory_space<vmem>>, vector<128x128xf32>,
    %c0_41 = arith.constant 0 : index
    %c9 = arith.constant 9 : index
    %c0_42 = arith.constant 0 : index
    %43 = vector.load %arg12[%c0_41, %c9, %c0_42] : memref<10x32x128xbf16, #tpu.memory_space<vmem>>, vector<8x16x128xbf16>
    %44 = vector.shape_cast %43 : vector<8x16x128xbf16> to vector<128x128xbf16>
    %c2 = arith.constant 2 : index
    %c0_43 = arith.constant 0 : index
    %c0_44 = arith.constant 0 : index
    %45 = vector.load %arg7[%c2, %c0_43, %c0_44] : memref<9x128x128xbf16, #tpu.memory_space<vmem>>, vector<1x128x128xbf16>
    %46 = vector.shape_cast %45 : vector<1x128x128xbf16> to vector<128x128xbf16>
    %cst_45 = arith.constant dense<0.000000e+00> : vector<128x128xf32>
    %47 = tpu.matmul %44, %46, %cst_45 {dimension_numbers = #tpu.dot_dimension_numbers<[1], [0], [0], [1], [0, 0, 1, 1], [], []>} : vector<128x128xbf16>, vector<128x128xbf16>, vector<128x128xf32> -> vector<128x128xf32>
    %c0_46 = arith.constant 0 : index
    %c0_47 = arith.constant 0 : index
    %48 = vector.load %arg13[%c0_46, %c0_47] : memref<128x128xf32, #tpu.memory_space<vmem>>, vector<128x128xf32>
    %49 = arith.addf %48, %47 : vector<128x128xf32>
    %c0_48 = arith.constant 0 : index
    %c0_49 = arith.constant 0 : index
    %50 = vector.load %arg13[%c0_48, %c0_49] : memref<128x128xf32, #tpu.memory_space<vmem>>, vector<128x128xf32>
    tpu.vector_store %arg13[%c0_48, %c0_49], %49 {strides = array<i32>} : memref<128x128xf32, #tpu.memory_space<vmem>>, vector<128x128xf32>,
    %c1_50 = arith.constant 1 : index
    %c7_51 = arith.constant 7 : index
    %c0_52 = arith.constant 0 : index
    %51 = vector.load %arg12[%c1_50, %c7_51, %c0_52] : memref<10x32x128xbf16, #tpu.memory_space<vmem>>, vector<8x16x128xbf16>
    %52 = vector.shape_cast %51 : vector<8x16x128xbf16> to vector<128x128xbf16>
    %c3 = arith.constant 3 : index
    %c0_53 = arith.constant 0 : index
    %c0_54 = arith.constant 0 : index
    %53 = vector.load %arg7[%c3, %c0_53, %c0_54] : memref<9x128x128xbf16, #tpu.memory_space<vmem>>, vector<1x128x128xbf16>
    %54 = vector.shape_cast %53 : vector<1x128x128xbf16> to vector<128x128xbf16>
    %cst_55 = arith.constant dense<0.000000e+00> : vector<128x128xf32>
    %55 = tpu.matmul %52, %54, %cst_55 {dimension_numbers = #tpu.dot_dimension_numbers<[1], [0], [0], [1], [0, 0, 1, 1], [], []>} : vector<128x128xbf16>, vector<128x128xbf16>, vector<128x128xf32> -> vector<128x128xf32>
    %c0_56 = arith.constant 0 : index
    %c0_57 = arith.constant 0 : index
    %56 = vector.load %arg13[%c0_56, %c0_57] : memref<128x128xf32, #tpu.memory_space<vmem>>, vector<128x128xf32>
    %57 = arith.addf %56, %55 : vector<128x128xf32>
    %c0_58 = arith.constant 0 : index
    %c0_59 = arith.constant 0 : index
    %58 = vector.load %arg13[%c0_58, %c0_59] : memref<128x128xf32, #tpu.memory_space<vmem>>, vector<128x128xf32>
    tpu.vector_store %arg13[%c0_58, %c0_59], %57 {strides = array<i32>} : memref<128x128xf32, #tpu.memory_space<vmem>>, vector<128x128xf32>,
    %c1_60 = arith.constant 1 : index
    %c8_61 = arith.constant 8 : index
    %c0_62 = arith.constant 0 : index
    %59 = vector.load %arg12[%c1_60, %c8_61, %c0_62] : memref<10x32x128xbf16, #tpu.memory_space<vmem>>, vector<8x16x128xbf16>
    %60 = vector.shape_cast %59 : vector<8x16x128xbf16> to vector<128x128xbf16>
    %c4 = arith.constant 4 : index
    %c0_63 = arith.constant 0 : index
    %c0_64 = arith.constant 0 : index
    %61 = vector.load %arg7[%c4, %c0_63, %c0_64] : memref<9x128x128xbf16, #tpu.memory_space<vmem>>, vector<1x128x128xbf16>
    %62 = vector.shape_cast %61 : vector<1x128x128xbf16> to vector<128x128xbf16>
    %cst_65 = arith.constant dense<0.000000e+00> : vector<128x128xf32>
    %63 = tpu.matmul %60, %62, %cst_65 {dimension_numbers = #tpu.dot_dimension_numbers<[1], [0], [0], [1], [0, 0, 1, 1], [], []>} : vector<128x128xbf16>, vector<128x128xbf16>, vector<128x128xf32> -> vector<128x128xf32>
    %c0_66 = arith.constant 0 : index
    %c0_67 = arith.constant 0 : index
    %64 = vector.load %arg13[%c0_66, %c0_67] : memref<128x128xf32, #tpu.memory_space<vmem>>, vector<128x128xf32>
    %65 = arith.addf %64, %63 : vector<128x128xf32>
    %c0_68 = arith.constant 0 : index
    %c0_69 = arith.constant 0 : index
    %66 = vector.load %arg13[%c0_68, %c0_69] : memref<128x128xf32, #tpu.memory_space<vmem>>, vector<128x128xf32>
    tpu.vector_store %arg13[%c0_68, %c0_69], %65 {strides = array<i32>} : memref<128x128xf32, #tpu.memory_space<vmem>>, vector<128x128xf32>,
    %c1_70 = arith.constant 1 : index
    %c9_71 = arith.constant 9 : index
    %c0_72 = arith.constant 0 : index
    %67 = vector.load %arg12[%c1_70, %c9_71, %c0_72] : memref<10x32x128xbf16, #tpu.memory_space<vmem>>, vector<8x16x128xbf16>
    %68 = vector.shape_cast %67 : vector<8x16x128xbf16> to vector<128x128xbf16>
    %c5 = arith.constant 5 : index
    %c0_73 = arith.constant 0 : index
    %c0_74 = arith.constant 0 : index
    %69 = vector.load %arg7[%c5, %c0_73, %c0_74] : memref<9x128x128xbf16, #tpu.memory_space<vmem>>, vector<1x128x128xbf16>
    %70 = vector.shape_cast %69 : vector<1x128x128xbf16> to vector<128x128xbf16>
    %cst_75 = arith.constant dense<0.000000e+00> : vector<128x128xf32>
    %71 = tpu.matmul %68, %70, %cst_75 {dimension_numbers = #tpu.dot_dimension_numbers<[1], [0], [0], [1], [0, 0, 1, 1], [], []>} : vector<128x128xbf16>, vector<128x128xbf16>, vector<128x128xf32> -> vector<128x128xf32>
    %c0_76 = arith.constant 0 : index
    %c0_77 = arith.constant 0 : index
    %72 = vector.load %arg13[%c0_76, %c0_77] : memref<128x128xf32, #tpu.memory_space<vmem>>, vector<128x128xf32>
    %73 = arith.addf %72, %71 : vector<128x128xf32>
    %c0_78 = arith.constant 0 : index
    %c0_79 = arith.constant 0 : index
    %74 = vector.load %arg13[%c0_78, %c0_79] : memref<128x128xf32, #tpu.memory_space<vmem>>, vector<128x128xf32>
    tpu.vector_store %arg13[%c0_78, %c0_79], %73 {strides = array<i32>} : memref<128x128xf32, #tpu.memory_space<vmem>>, vector<128x128xf32>,
    %c2_80 = arith.constant 2 : index
    %c7_81 = arith.constant 7 : index
    %c0_82 = arith.constant 0 : index
    %75 = vector.load %arg12[%c2_80, %c7_81, %c0_82] : memref<10x32x128xbf16, #tpu.memory_space<vmem>>, vector<8x16x128xbf16>
    %76 = vector.shape_cast %75 : vector<8x16x128xbf16> to vector<128x128xbf16>
    %c6 = arith.constant 6 : index
    %c0_83 = arith.constant 0 : index
    %c0_84 = arith.constant 0 : index
    %77 = vector.load %arg7[%c6, %c0_83, %c0_84] : memref<9x128x128xbf16, #tpu.memory_space<vmem>>, vector<1x128x128xbf16>
    %78 = vector.shape_cast %77 : vector<1x128x128xbf16> to vector<128x128xbf16>
    %cst_85 = arith.constant dense<0.000000e+00> : vector<128x128xf32>
    %79 = tpu.matmul %76, %78, %cst_85 {dimension_numbers = #tpu.dot_dimension_numbers<[1], [0], [0], [1], [0, 0, 1, 1], [], []>} : vector<128x128xbf16>, vector<128x128xbf16>, vector<128x128xf32> -> vector<128x128xf32>
    %c0_86 = arith.constant 0 : index
    %c0_87 = arith.constant 0 : index
    %80 = vector.load %arg13[%c0_86, %c0_87] : memref<128x128xf32, #tpu.memory_space<vmem>>, vector<128x128xf32>
    %81 = arith.addf %80, %79 : vector<128x128xf32>
    %c0_88 = arith.constant 0 : index
    %c0_89 = arith.constant 0 : index
    %82 = vector.load %arg13[%c0_88, %c0_89] : memref<128x128xf32, #tpu.memory_space<vmem>>, vector<128x128xf32>
    tpu.vector_store %arg13[%c0_88, %c0_89], %81 {strides = array<i32>} : memref<128x128xf32, #tpu.memory_space<vmem>>, vector<128x128xf32>,
    %c2_90 = arith.constant 2 : index
    %c8_91 = arith.constant 8 : index
    %c0_92 = arith.constant 0 : index
    %83 = vector.load %arg12[%c2_90, %c8_91, %c0_92] : memref<10x32x128xbf16, #tpu.memory_space<vmem>>, vector<8x16x128xbf16>
    %84 = vector.shape_cast %83 : vector<8x16x128xbf16> to vector<128x128xbf16>
    %c7_93 = arith.constant 7 : index
    %c0_94 = arith.constant 0 : index
    %c0_95 = arith.constant 0 : index
    %85 = vector.load %arg7[%c7_93, %c0_94, %c0_95] : memref<9x128x128xbf16, #tpu.memory_space<vmem>>, vector<1x128x128xbf16>
    %86 = vector.shape_cast %85 : vector<1x128x128xbf16> to vector<128x128xbf16>
    %cst_96 = arith.constant dense<0.000000e+00> : vector<128x128xf32>
    %87 = tpu.matmul %84, %86, %cst_96 {dimension_numbers = #tpu.dot_dimension_numbers<[1], [0], [0], [1], [0, 0, 1, 1], [], []>} : vector<128x128xbf16>, vector<128x128xbf16>, vector<128x128xf32> -> vector<128x128xf32>
    %c0_97 = arith.constant 0 : index
    %c0_98 = arith.constant 0 : index
    %88 = vector.load %arg13[%c0_97, %c0_98] : memref<128x128xf32, #tpu.memory_space<vmem>>, vector<128x128xf32>
    %89 = arith.addf %88, %87 : vector<128x128xf32>
    %c0_99 = arith.constant 0 : index
    %c0_100 = arith.constant 0 : index
    %90 = vector.load %arg13[%c0_99, %c0_100] : memref<128x128xf32, #tpu.memory_space<vmem>>, vector<128x128xf32>
    tpu.vector_store %arg13[%c0_99, %c0_100], %89 {strides = array<i32>} : memref<128x128xf32, #tpu.memory_space<vmem>>, vector<128x128xf32>,
    %c2_101 = arith.constant 2 : index
    %c9_102 = arith.constant 9 : index
    %c0_103 = arith.constant 0 : index
    %91 = vector.load %arg12[%c2_101, %c9_102, %c0_103] : memref<10x32x128xbf16, #tpu.memory_space<vmem>>, vector<8x16x128xbf16>
    %92 = vector.shape_cast %91 : vector<8x16x128xbf16> to vector<128x128xbf16>
    %c8_104 = arith.constant 8 : index
    %c0_105 = arith.constant 0 : index
    %c0_106 = arith.constant 0 : index
    %93 = vector.load %arg7[%c8_104, %c0_105, %c0_106] : memref<9x128x128xbf16, #tpu.memory_space<vmem>>, vector<1x128x128xbf16>
    %94 = vector.shape_cast %93 : vector<1x128x128xbf16> to vector<128x128xbf16>
    %cst_107 = arith.constant dense<0.000000e+00> : vector<128x128xf32>
    %95 = tpu.matmul %92, %94, %cst_107 {dimension_numbers = #tpu.dot_dimension_numbers<[1], [0], [0], [1], [0, 0, 1, 1], [], []>} : vector<128x128xbf16>, vector<128x128xbf16>, vector<128x128xf32> -> vector<128x128xf32>
    %c0_108 = arith.constant 0 : index
    %c0_109 = arith.constant 0 : index
    %96 = vector.load %arg13[%c0_108, %c0_109] : memref<128x128xf32, #tpu.memory_space<vmem>>, vector<128x128xf32>
    %97 = arith.addf %96, %95 : vector<128x128xf32>
    %c0_110 = arith.constant 0 : index
    %c0_111 = arith.constant 0 : index
    %98 = vector.load %arg13[%c0_110, %c0_111] : memref<128x128xf32, #tpu.memory_space<vmem>>, vector<128x128xf32>
    tpu.vector_store %arg13[%c0_110, %c0_111], %97 {strides = array<i32>} : memref<128x128xf32, #tpu.memory_space<vmem>>, vector<128x128xf32>,
    %c0_112 = arith.constant 0 : index
    %c0_113 = arith.constant 0 : index
    %99 = vector.load %arg13[%c0_112, %c0_113] : memref<128x128xf32, #tpu.memory_space<vmem>>, vector<128x128xf32>
    %c0_114 = arith.constant 0 : index
    %c0_115 = arith.constant 0 : index
    %100 = vector.load %arg8[%c0_114, %c0_115] : memref<1x128xf32, #tpu.memory_space<vmem>>, vector<1x128xf32>
    %101 = vector.broadcast %100 : vector<1x128xf32> to vector<128x128xf32>
    %102 = arith.addf %99, %101 : vector<128x128xf32>
    %cst_116 = arith.constant 0.000000e+00 : f32
    %103 = vector.broadcast %cst_116 : f32 to vector<128x128xf32>
    %104 = arith.maximumf %102, %103 : vector<128x128xf32>
    %105 = arith.truncf %104 : vector<128x128xf32> to vector<128x128xbf16>
    %c0_117 = arith.constant 0 : index
    %c0_118 = arith.constant 0 : index
    %106 = vector.load %arg9[%c0_117, %c0_118] : memref<128x16xbf16, #tpu.memory_space<vmem>>, vector<128x16xbf16>
    %cst_119 = arith.constant dense<0.000000e+00> : vector<128x16xf32>
    %107 = tpu.matmul %105, %106, %cst_119 {dimension_numbers = #tpu.dot_dimension_numbers<[1], [0], [0], [1], [0, 0, 1, 1], [], []>} : vector<128x128xbf16>, vector<128x16xbf16>, vector<128x16xf32> -> vector<128x16xf32>
    %c0_120 = arith.constant 0 : index
    %c0_121 = arith.constant 0 : index
    %108 = vector.load %arg10[%c0_120, %c0_121] : memref<1x16xf32, #tpu.memory_space<vmem>>, vector<1x16xf32>
    %109 = vector.broadcast %108 : vector<1x16xf32> to vector<128x16xf32>
    %110 = arith.addf %107, %109 : vector<128x16xf32>
    %c0_122 = arith.constant 0 : index
    %c0_123 = arith.constant 0 : index
    %c0_124 = arith.constant 0 : index
    %c0_125 = arith.constant 0 : index
    %111 = vector.load %arg2[%c0_122, %c0_123, %c0_124, %c0_125] : memref<1x8x16x16xf32, #tpu.memory_space<vmem>>, vector<1x8x16x16xf32>
    %112 = vector.shape_cast %111 : vector<1x8x16x16xf32> to vector<128x16xf32>
    %113 = arith.addf %110, %112 : vector<128x16xf32>
    %cst_126 = arith.constant 0.000000e+00 : f32
    %114 = vector.broadcast %cst_126 : f32 to vector<128x16xf32>
    %115 = arith.maximumf %113, %114 : vector<128x16xf32>
    %116 = vector.shape_cast %115 : vector<128x16xf32> to vector<1x8x16x16xf32>
    %c0_127 = arith.constant 0 : index
    %c0_128 = arith.constant 0 : index
    %c0_129 = arith.constant 0 : index
    %c0_130 = arith.constant 0 : index
    %117 = vector.load %arg11[%c0_127, %c0_128, %c0_129, %c0_130] : memref<1x8x16x16xf32, #tpu.memory_space<vmem>>, vector<1x8x16x16xf32>
    tpu.vector_store %arg11[%c0_127, %c0_128, %c0_129, %c0_130], %116 {strides = array<i32>} : memref<1x8x16x16xf32, #tpu.memory_space<vmem>>, vector<1x8x16x16xf32>,
    return
  }
  func.func @transform_0(%arg0: i32, %arg1: i32) -> (i32, i32, i32, i32) {
    %c0_i32 = arith.constant 0 : i32
    %c0_i32_0 = arith.constant 0 : i32
    %c0_i32_1 = arith.constant 0 : i32
    return %arg0, %arg1, %c0_i32, %c0_i32_0 : i32, i32, i32, i32
  }
  func.func @transform_1(%arg0: i32, %arg1: i32) -> (i32, i32, i32, i32) {
    %c8_i32 = arith.constant 8 : i32
    %0 = arith.muli %arg1, %c8_i32 : i32
    %c1_i32 = arith.constant 1 : i32
    %1 = arith.subi %0, %c1_i32 : i32
    %c0_i32 = arith.constant 0 : i32
    %2 = arith.maxsi %1, %c0_i32 : i32
    %c0_i32_0 = arith.constant 0 : i32
    %c0_i32_1 = arith.constant 0 : i32
    %c0_i32_2 = arith.constant 0 : i32
    return %arg0, %2, %c0_i32_0, %c0_i32_1 : i32, i32, i32, i32
  }
  func.func @transform_2(%arg0: i32, %arg1: i32) -> (i32, i32, i32, i32) {
    %c1_i32 = arith.constant 1 : i32
    %0 = arith.addi %arg1, %c1_i32 : i32
    %c8_i32 = arith.constant 8 : i32
    %1 = arith.muli %0, %c8_i32 : i32
    %c15_i32 = arith.constant 15 : i32
    %2 = arith.minsi %1, %c15_i32 : i32
    %c0_i32 = arith.constant 0 : i32
    %c0_i32_0 = arith.constant 0 : i32
    %c0_i32_1 = arith.constant 0 : i32
    return %arg0, %2, %c0_i32, %c0_i32_0 : i32, i32, i32, i32
  }
  func.func @transform_3(%arg0: i32, %arg1: i32) -> (i32, i32) {
    %c0_i32 = arith.constant 0 : i32
    %c0_i32_0 = arith.constant 0 : i32
    %c0_i32_1 = arith.constant 0 : i32
    return %c0_i32, %c0_i32_0 : i32, i32
  }
  func.func @transform_4(%arg0: i32, %arg1: i32) -> (i32, i32) {
    %c0_i32 = arith.constant 0 : i32
    %c0_i32_0 = arith.constant 0 : i32
    %c0_i32_1 = arith.constant 0 : i32
    return %c0_i32, %c0_i32_0 : i32, i32
  }
  func.func @transform_5(%arg0: i32, %arg1: i32) -> (i32, i32, i32) {
    %c0_i32 = arith.constant 0 : i32
    %c0_i32_0 = arith.constant 0 : i32
    %c0_i32_1 = arith.constant 0 : i32
    %c0_i32_2 = arith.constant 0 : i32
    return %c0_i32, %c0_i32_0, %c0_i32_1 : i32, i32, i32
  }
  func.func @transform_6(%arg0: i32, %arg1: i32) -> (i32, i32) {
    %c0_i32 = arith.constant 0 : i32
    %c0_i32_0 = arith.constant 0 : i32
    %c0_i32_1 = arith.constant 0 : i32
    return %c0_i32, %c0_i32_0 : i32, i32
  }
  func.func @transform_7(%arg0: i32, %arg1: i32) -> (i32, i32) {
    %c0_i32 = arith.constant 0 : i32
    %c0_i32_0 = arith.constant 0 : i32
    %c0_i32_1 = arith.constant 0 : i32
    return %c0_i32, %c0_i32_0 : i32, i32
  }
  func.func @transform_8(%arg0: i32, %arg1: i32) -> (i32, i32) {
    %c0_i32 = arith.constant 0 : i32
    %c0_i32_0 = arith.constant 0 : i32
    %c0_i32_1 = arith.constant 0 : i32
    return %c0_i32, %c0_i32_0 : i32, i32
  }
  func.func @transform_9(%arg0: i32, %arg1: i32) -> (i32, i32, i32, i32) {
    %c0_i32 = arith.constant 0 : i32
    %c0_i32_0 = arith.constant 0 : i32
    %c0_i32_1 = arith.constant 0 : i32
    return %arg0, %arg1, %c0_i32, %c0_i32_0 : i32, i32, i32, i32
  }
}

</mosaic_0001>

<bundles_post_ra>
// kernel: bottleneck_forward.1
= control target key start
LH: loop header
LB: loop body
LE: loop exit
PB: predicated region body
PF: predicated region fallthrough
CT: control target
= control target key end

     0   :  { %s5479_s30 = smov 0   ;;  %s5481_s10 = smov 0   ;;  %s6058_s0 = inlined_call_operand.vmem [shape: f32[2,16,16,16], index: 0, kind: input, shape index: {}, may-alias: {0,1,2}]   ;;  %s6059_s1 = inlined_call_operand.vmem [shape: f32[2,16,16,16], index: 1, kind: input, shape index: {}, may-alias: {0,1,2}]   ;;  %s6060_s2 = inlined_call_operand.vmem [shape: f32[2,16,16,16], index: 2, kind: input, shape index: {}, may-alias: {0,1,2}]   ;;  %s6061_s3 = inlined_call_operand.vmem [shape: bf16[16,128], index: 3, kind: input, shape index: {}]   ;;  %s6062_s4 = inlined_call_operand.vmem [shape: f32[1,128], index: 4, kind: input, shape index: {}]   ;;  %s6063_s5 = inlined_call_operand.vmem [shape: bf16[9,128,128], index: 5, kind: input, shape index: {}]   ;;  %s6064_s6 = inlined_call_operand.vmem [shape: f32[1,128], index: 6, kind: input, shape index: {}]   ;;  %s6065_s7 = inlined_call_operand.vmem [shape: bf16[128,16], index: 7, kind: input, shape index: {}]   ;;  %s6066_s8 = inlined_call_operand.vmem [shape: f32[1,16], index: 8, kind: input, shape index: {}]   ;;  %s6067_s9 = inlined_call_operand.vmem [shape: f32[2,16,16,16], index: 9, kind: output, shape index: {}]  }
   0x1   :  { %s5483_s11 = smov 0   ;;  %s5485_s12 = smov 0  }
   0x2   :  { %s5487_s13 = smov 0  }
   0x3 LB: > { %s28_s14 = sadd.s32 1, %s5412_s11  ;;  %s31_s15 = sadd.s32 1, %s5416_s12  ;;  %s5420_s13 = sphi %s5487_s13, %s19_s13   ;;  %s5416_s12 = sphi %s5485_s12, %s6072_s12   ;;  %s5412_s11 = sphi %s5483_s11, %s6071_s11   ;;  %s5408_s10 = sphi %s5481_s10, %s6070_s10   ;;  %s5404_s30 = sphi %s5479_s30, %s6069_s30  }
   0x4   : > { %p29_p0 = scmp.ge.s32.totalorder %s28_s14, 2  ;;  %p4339_p1 = scmp.ge.s32.totalorder %s5420_s13, 1 }
   0x5   : > { %p373_p2 = scmp.lt.s32.totalorder %s5420_s13, 5 }
   0x6   : > { %s6074_s14 = smov (%p29_p0, %s28_s14), 0  ;;  %s6076_s15 = smov (!%p29_p0, %s31_s15), %s5416_s12 }
   0x7   : > { %p374_p3 = pnand %p4339_p1, %p373_p2  ;;  %p33_p4 = scmp.ge.s32.totalorder %s6076_s15, 2 }
   0x8   : > { %v5516_v0 = vld [vmem:[%s6061_s3] sm:$0xff] (!%p374_p3)   ;;  %v5422_v1 = vmov (!%p374_p3), 0   ;;  %s4340_s18 = sshll.u32 (!%p374_p3), %s5404_s30, 3  ;;  %p446_p5 = scmp.lt.s32.totalorder (!%p374_p3), %s5408_s10, 1  ;;  %vm561_vm0 = vcmask (!%p374_p3), 130048  }
   0x9   : > { %s6078_s15 = smov (%p33_p4, %s6076_s15), 0  ;;  %377 = sbr.rel (%p374_p3) target bundleno = 1365 (0x555), region = 56 }
   0xa   : > { %505 = vst [vmem:[#allocation2] sm:$0xf] (!%p374_p3), %v5422_v1  ;;  %506 = vst [vmem:[#allocation2 + $0x10] sm:$0xf] (!%p374_p3), %v5422_v1  ;;  %4774 = vmatprep.subr.bf16.mxu0 (!%p374_p3), %v5516_v0  ;;  %5124 = vmatprep.subr.bf16.mxu1 (!%p374_p3), %v5516_v0  ;;  %p448_p6 = scmp.lt.s32.totalorder (!%p374_p3), %s4340_s18, 15  ;;  %s4345_s19 = sadd.s32 (!%p374_p3), 4294967295, %s4340_s18 }
   0xb   : > { %507 = vst [vmem:[#allocation2 + $0x20] sm:$0xf] (!%p374_p3), %v5422_v1  ;;  %508 = vst [vmem:[#allocation2 + $0x30] sm:$0xf] (!%p374_p3), %v5422_v1  ;;  %4775 = vmatpush3.bf16.msra.mxu0 (!%p374_p3), %v5516_v0  ;;  %5125 = vmatpush3.bf16.msra.mxu1 (!%p374_p3), %v5516_v0  ;;  %p458_p7 = scmp.gt.s32.totalorder (!%p374_p3), %s4345_s19, 0  ;;  %p4346_p8 = scmp.lt.s32.totalorder (!%p374_p3), %s4345_s19, 15 }
   0xc   : > { %509 = vst [vmem:[#allocation2 + $0x40] sm:$0xf] (!%p374_p3), %v5422_v1  ;;  %510 = vst [vmem:[#allocation2 + $0x50] sm:$0xf] (!%p374_p3), %v5422_v1  ;;  %s4600_s24 = sadd.s32 (!%p374_p3), 8, %s4340_s18  ;;  %p4375_p10 = scmp.ne.s32.totalorder (!%p374_p3), %s5404_s30, 0 }
   0xd   : > { %511 = vst [vmem:[#allocation2 + $0x60] sm:$0xf] (!%p374_p3), %v5422_v1  ;;  %512 = vst [vmem:[#allocation2 + $0x70] sm:$0xf] (!%p374_p3), %v5422_v1  ;;  %p5528_p9 = scmp.lt.s32.totalorder (!%p374_p3), %s4600_s24, 15 }
   0xe   : > { %513 = vst [vmem:[#allocation2 + $0x80] sm:$0xf] (!%p374_p3), %v5422_v1  ;;  %514 = vst [vmem:[#allocation2 + $0x90] sm:$0xf] (!%p374_p3), %v5422_v1  ;;  %v5586_v26 = vld [vmem:[%s6062_s4] ss:$0 sm:$0xff] (!%p374_p3) }
   0xf   : > { %515 = vst [vmem:[#allocation2 + $0x8] sm:$0xf0] (!%p374_p3), %v5422_v1  ;;  %516 = vst [vmem:[#allocation2 + $0x18] sm:$0xf0] (!%p374_p3), %v5422_v1 }
  0x10   : > { %517 = vst [vmem:[#allocation2 + $0x28] sm:$0xf0] %v5422_v1  ;;  %518 = vst [vmem:[#allocation2 + $0x38] sm:$0xf0] %v5422_v1  ;;  %s6080_s10 = smov (!%p446_p5, %s5408_s10), 1  ;;  %s6082_s24 = smov (!%p5528_p9, %s4600_s24), 15 }
  0x11   : > { %519 = vst [vmem:[#allocation2 + $0x48] sm:$0xf0] %v5422_v1  ;;  %520 = vst [vmem:[#allocation2 + $0x58] sm:$0xf0] %v5422_v1  ;;  %s449_s20 = scalar_select %p448_p6, %s4340_s18, 15 }
  0x12   : > { %521 = vst [vmem:[#allocation2 + $0x68] sm:$0xf0] %v5422_v1  ;;  %522 = vst [vmem:[#allocation2 + $0x78] sm:$0xf0] %v5422_v1  ;;  %s5525_s21 = sshll.u32 %s6080_s10, 5  ;;  %s6086_s24 = smov (!%p5528_p9, %s6082_s24), 15 }
  0x13   : > { %523 = vst [vmem:[#allocation2 + $0x88] sm:$0xf0] %v5422_v1  ;;  %524 = vst [vmem:[#allocation2 + $0x98] sm:$0xf0] %v5422_v1  ;;  %s4341_s22 = sshll.u32 %s449_s20, 1 }
  0x14   : > { %s452_s23 = sadd.s32 %s5525_s21, %s4341_s22  ;;  %s4358_s22 = sshll.u32 %s6086_s24, 1 }
  0x15   : > { %s4343_s25 = sshll.u32 %s452_s23, 3 }
  0x16   : > { %s5535_s29 = scalar_lea.vmem %s6058_s0, %s4343_s25  ;;  %s5540_s17 = scalar_lea.vmem %s6067_s9, %s4343_s25 }
  0x17   : > { %s459_s18 = scalar_select %p458_p7, %s4345_s19, 0  ;;  %v525_v2 = vld [vmem:[%s5535_s29] sm:$0xff]  ;;  %v526_v3 = vld [vmem:[%s5535_s29 + $0x8] sm:$0xff]  ;;  %v527_v7 = vld [vmem:[%s5535_s29 + $0x10] sm:$0xff] }
  0x18   : > { %v533_v4 = vld [vmem:[%s5535_s29 + $0x40] sm:$0xff]  ;;  %v541_v5 = vpack.c.bf16 %v526_v3, %v525_v2  ;;  %v534_v6 = vld [vmem:[%s5535_s29 + $0x48] sm:$0xff]  ;;  %v528_v8 = vld [vmem:[%s5535_s29 + $0x18] sm:$0xff]  ;;  %s483_s25 = sadd.s32 %s4358_s22, %s5525_s21 }
  0x19   : > { %s6084_s18 = smov (!%p4346_p8, %s459_s18), 15  ;;  %v545_v9 = vpack.c.bf16 %v534_v6, %v533_v4  ;;  %v542_v10 = vpack.c.bf16 %v528_v8, %v527_v7  ;;  %v535_v11 = vld [vmem:[%s5535_s29 + $0x50] sm:$0xff]  ;;  %v536_v12 = vld [vmem:[%s5535_s29 + $0x58] sm:$0xff]  ;;  %v529_v13 = vld [vmem:[%s5535_s29 + $0x20] sm:$0xff]  ;;  %s4360_s16 = sshll.u32 %s483_s25, 3 }
  0x1a   : > { %4776 = vmatprep.mubr.msk.bf16.mxu0 %vm561_vm0, %v541_v5  ;;  %v546_v14 = vpack.c.bf16 %v536_v12, %v535_v11  ;;  %v530_v15 = vld [vmem:[%s5535_s29 + $0x28] sm:$0xff]  ;;  %v537_v16 = vld [vmem:[%s5535_s29 + $0x60] sm:$0xff]  ;;  %s4351_s19 = sshll.u32 %s6084_s18, 1  ;;  %v531_v20 = vld [vmem:[%s5535_s29 + $0x30] sm:$0xff]  ;;  %s5579_s18 = scalar_lea.vmem %s6060_s2, %s4360_s16 }
  0x1b   : > { %v538_v17 = vld [vmem:[%s5535_s29 + $0x68] sm:$0xff]  ;;  %4784 = vmatprep.mubr.msk.bf16.mxu1 %vm561_vm0, %v545_v9  ;;  %4777 = vmatmul.mubr.msk.bf16.vlgmr.msra.gmra.mrb[0].mxu0 %vm561_vm0, %v542_v10  ;;  %v543_v18 = vpack.c.bf16 %v530_v15, %v529_v13  ;;  %s466_s20 = sadd.s32 %s4351_s19, %s5525_s21  ;;  %v532_v21 = vld [vmem:[%s5535_s29 + $0x38] sm:$0xff]  ;;  %v539_v22 = vld [vmem:[%s5535_s29 + $0x70] sm:$0xff] }
  0x1c   : > { %v547_v19 = vpack.c.bf16 %v538_v17, %v537_v16  ;;  %4785 = vmatmul.mubr.msk.bf16.vlgmr.msra.gmra.mrb[0].mxu1 %vm561_vm0, %v546_v14  ;;  %s4353_s23 = sshll.u32 %s466_s20, 3  ;;  %v540_v23 = vld [vmem:[%s5535_s29 + $0x78] sm:$0xff]  ;;  %v544_v24 = vpack.c.bf16 %v532_v21, %v531_v20 }
  0x1d   : > { %4780 = vmatprep.mubr.msk.bf16.mxu0 %vm561_vm0, %v543_v18  ;;  %s5574_s28 = scalar_lea.vmem %s6059_s1, %s4353_s23  ;;  %v548_v25 = vpack.c.bf16 %v540_v23, %v539_v22 }
  0x1e   : > { %4788 = vmatprep.mubr.msk.bf16.mxu1 %vm561_vm0, %v547_v19 }
  0x23   : > { %4781 = vmatmul.mubr.msk.bf16.gmra.mrb[4].mxu0 %vm561_vm0, %v544_v24 }
  0x24   : > { %4789 = vmatmul.mubr.msk.bf16.gmra.mrb[4].mxu1 %vm561_vm0, %v548_v25 }
  0xee   : > { %v4778_v27 = vpop.f32.mrb[0].mxu0 }
  0xef   : > { %v629_v28 = vadd.f32 %v4778_v27, %v5586_v26  ;;  %v4786_v29 = vpop.f32.mrb[0].mxu1  ;;  %v620_v30 = vpop.f32.mrb[1].mxu0 }
  0xf0   : > { %v661_v31 = vadd.f32 %v4786_v29, %v5586_v26  ;;  %v621_v32 = vadd.f32 %v5586_v26, %v620_v30  ;;  %v652_v33 = vpop.f32.mrb[1].mxu1  ;;  %v4779_v34 = vpop.f32.mrb[2].mxu0  ;;  %v5423_v29 = vmov (!%p4375_p10), 0  }
  0xf1   : > { %v653_v35 = vadd.f32 %v5586_v26, %v652_v33  ;;  %v632_v36 = vadd.f32 %v4779_v34, %v5586_v26  ;;  %v4787_v37 = vpop.f32.mrb[2].mxu1  ;;  %v623_v38 = vpop.f32.mrb[3].mxu0  ;;  %v685_v42 = vmax.f32 %v629_v28, 0.0  ;;  %752 = vst [vmem:[#allocation2] sm:$0xf0] (!%p4375_p10), %v5423_v29 }
  0xf2   : > { %v664_v39 = vadd.f32 %v4787_v37, %v5586_v26  ;;  %v624_v40 = vadd.f32 %v5586_v26, %v623_v38  ;;  %v655_v41 = vpop.f32.mrb[3].mxu1  ;;  %v693_v45 = vmax.f32 %v661_v31, 0.0  ;;  %v683_v46 = vmax.f32 %v621_v32, 0.0  ;;  %753 = vst [vmem:[#allocation2 + $0x8] sm:$0xf] (!%p4375_p10), %v5423_v29 }
  0xf3   : > { %v686_v43 = vmax.f32 %v632_v36, 0.0  ;;  %v656_v44 = vadd.f32 %v5586_v26, %v655_v41  ;;  %v691_v49 = vmax.f32 %v653_v35, 0.0 }
  0xf4   : > { %v694_v47 = vmax.f32 %v664_v39, 0.0  ;;  %v684_v48 = vmax.f32 %v624_v40, 0.0 }
  0xf5   : > { %v700_v50 = vpack.c.bf16 %v686_v43, %v685_v42  ;;  %v692_v51 = vmax.f32 %v656_v44, 0.0 }
  0xf6   : > { %v704_v52 = vpack.c.bf16 %v694_v47, %v693_v45  ;;  %v699_v53 = vpack.c.bf16 %v684_v48, %v683_v46  ;;  %v4782_v54 = vpop.f32.mrb[4].mxu0 }
  0xf7   : > { %v716_v55 = vrot.slane %v700_v50, 4  ;;  %v703_v56 = vpack.c.bf16 %v692_v51, %v691_v49  ;;  %v645_v57 = vadd.f32 %v4782_v54, %v5586_v26  ;;  %v4790_v58 = vpop.f32.mrb[4].mxu1  ;;  %v636_v59 = vpop.f32.mrb[5].mxu0 }
  0xf8   : > { %v720_v60 = vrot.slane %v704_v52, 4  ;;  %v715_v61 = vrot.slane %v699_v53, 4  ;;  %v677_v62 = vadd.f32 %v4790_v58, %v5586_v26  ;;  %v637_v63 = vadd.f32 %v5586_v26, %v636_v59  ;;  %v668_v1 = vpop.f32.mrb[5].mxu1  ;;  %v4783_v2 = vpop.f32.mrb[6].mxu0 }
  0xf9   : > { %734 = vst [vmem:[#allocation2 + $0x28] ss:$-4 sps:$4 sm:$0xff] %v716_v55   ;;  %v719_v3 = vrot.slane %v703_v56, 4  ;;  %v669_v4 = vadd.f32 %v5586_v26, %v668_v1  ;;  %v648_v5 = vadd.f32 %v4783_v2, %v5586_v26  ;;  %v4791_v6 = vpop.f32.mrb[6].mxu1  ;;  %v639_v7 = vpop.f32.mrb[7].mxu0  ;;  %v689_v11 = vmax.f32 %v645_v57, 0.0 }
  0xfa   : > { %742 = vst [vmem:[#allocation2 + $0x68] ss:$-4 sps:$4 sm:$0xff] %v720_v60   ;;  %732 = vst [vmem:[#allocation2 + $0x18] ss:$-4 sps:$4 sm:$0xff] %v715_v61   ;;  %v680_v8 = vadd.f32 %v4791_v6, %v5586_v26  ;;  %v640_v9 = vadd.f32 %v5586_v26, %v639_v7  ;;  %v671_v10 = vpop.f32.mrb[7].mxu1  ;;  %v697_v14 = vmax.f32 %v677_v62, 0.0 }
  0xfb   : > { %740 = vst [vmem:[#allocation2 + $0x58] ss:$-4 sps:$4 sm:$0xff] %v719_v3   ;;  %v690_v12 = vmax.f32 %v648_v5, 0.0  ;;  %v672_v13 = vadd.f32 %v5586_v26, %v671_v10  ;;  %v687_v15 = vmax.f32 %v637_v63, 0.0  ;;  %v695_v18 = vmax.f32 %v669_v4, 0.0 }
  0xfc   : > { %v698_v16 = vmax.f32 %v680_v8, 0.0  ;;  %v688_v17 = vmax.f32 %v640_v9, 0.0 }
  0xfd   : > { %v702_v19 = vpack.c.bf16 %v690_v12, %v689_v11  ;;  %v696_v20 = vmax.f32 %v672_v13, 0.0  ;;  %751 = sbr.rel (%p4375_p10) target bundleno = 260 (0x104), region = 60 }
  0xfe   : > { %v706_v21 = vpack.c.bf16 %v698_v16, %v697_v14  ;;  %v701_v22 = vpack.c.bf16 %v688_v17, %v687_v15 }
  0xff   : > { %v718_v23 = vrot.slane %v702_v19, 4  ;;  %v705_v24 = vpack.c.bf16 %v696_v20, %v695_v18 }
 0x100   : > { %v722_v25 = vrot.slane %v706_v21, 4  ;;  %v717_v27 = vrot.slane %v701_v22, 4 }
 0x101   : > { %738 = vst [vmem:[#allocation2 + $0x48] ss:$-4 sps:$4 sm:$0xff] %v718_v23   ;;  %v721_v28 = vrot.slane %v705_v24, 4 }
 0x102   : > { %746 = vst [vmem:[#allocation2 + $0x88] ss:$-4 sps:$4 sm:$0xff] %v722_v25   ;;  %736 = vst [vmem:[#allocation2 + $0x38] ss:$-4 sps:$4 sm:$0xff] %v717_v27  }
 0x103   : > { %744 = vst [vmem:[#allocation2 + $0x78] ss:$-4 sps:$4 sm:$0xff] %v721_v28  }
 0x104 PF: > { %p4376_p11 = scmp.le.s32.totalorder %s5404_s30, 0 }
 0x105   : > { %v758_v30 = vld [vmem:[%s5574_s28] sm:$0xff] (!%p4376_p11)  ;;  %v759_v31 = vld [vmem:[%s5574_s28 + $0x8] sm:$0xff] (!%p4376_p11)  ;;  %v5424_v32 = vmov (!%p4376_p11), 0.0   ;;  %vm5425_vm1 = vmmov (!%p4376_p11), 0  }
 0x106   : > { %757 = sbr.rel (%p4376_p11) target bundleno = 489 (0x1e9), region = 64  ;;  %4792 = vmatprep.subr.bf16.mxu0 (!%p4376_p11), %v5424_v32  ;;  %4794 = vmatprep.mubr.msk.bf16.mxu0 (!%p4376_p11), %vm5425_vm1, %v5424_v32  ;;  %v760_v33 = vpack.c.bf16 (!%p4376_p11), %v759_v31, %v758_v30 }
 0x107   : > { %4793 = vmatpush3.bf16.msra.mxu0 (!%p4376_p11), %v5516_v0 }
 0x10a   : > { %4795 = vmatmul.mubr.msk.bf16.vlgmr.msra.gmra.mrb[0].mxu0 (!%p4376_p11), %vm561_vm0, %v760_v33 }
 0x1dd   : > { %v798_v34 = vpop.f32.mrb[0].mxu0 }
 0x1de   : > { %v799_v35 = vadd.f32 %v5586_v26, %v798_v34  ;;  %v4796_v36 = vpop.f32.mrb[1].mxu0 }
 0x1df   : > { %v801_v37 = vpop.f32.mrb[2].mxu0 }
 0x1e0   : > { %v802_v38 = vadd.f32 %v5586_v26, %v801_v37  ;;  %v4797_v39 = vpop.f32.mrb[3].mxu0  ;;  %v805_v40 = vmax.f32 %v799_v35, 0.0 }
 0x1e2   : > { %v806_v41 = vmax.f32 %v802_v38, 0.0 }
 0x1e4   : > { %v807_v42 = vpack.c.bf16 %v806_v41, %v805_v40 }
 0x1e6   : > { %v809_v43 = vrot.slane %v807_v42, 4 }
 0x1e8   : > { %811 = vst [vmem:[#allocation2 + $0x8] ss:$-4 sps:$4 sm:$0xff] %v809_v43  }
 0x1e9 PF: > { %p4378_p12 = scmp.ne.s32.totalorder %s5404_s30, 1 }
 0x1ea   : > { %v5426_v44 = vmov (!%p4378_p12), 0  }
 0x1eb   : > { %816 = sbr.rel (%p4378_p12) target bundleno = 498 (0x1f2), region = 68  ;;  %818 = vst [vmem:[#allocation2 + $0x90] sm:$0xf0] (!%p4378_p12), %v5426_v44  ;;  %819 = vst [vmem:[#allocation2 + $0x98] sm:$0xf] (!%p4378_p12), %v5426_v44 }
 0x1f2 PF: > { %p4379_p13 = scmp.ge.s32.totalorder %s5404_s30, 1 }
 0x1f3   : > { %v824_v45 = vld [vmem:[%s5579_s18] sm:$0xff] (!%p4379_p13)  ;;  %v825_v46 = vld [vmem:[%s5579_s18 + $0x8] sm:$0xff] (!%p4379_p13)  ;;  %v5427_v47 = vmov (!%p4379_p13), 0.0   ;;  %vm5428_vm2 = vmmov (!%p4379_p13), 0  }
 0x1f4   : > { %823 = sbr.rel (%p4379_p13) target bundleno = 727 (0x2d7), region = 72  ;;  %4798 = vmatprep.subr.bf16.mxu0 (!%p4379_p13), %v5427_v47  ;;  %4800 = vmatprep.mubr.msk.bf16.mxu0 (!%p4379_p13), %vm5428_vm2, %v5427_v47  ;;  %v826_v48 = vpack.c.bf16 (!%p4379_p13), %v825_v46, %v824_v45 }
 0x1f5   : > { %4799 = vmatpush3.bf16.msra.mxu0 (!%p4379_p13), %v5516_v0 }
 0x1f8   : > { %4801 = vmatmul.mubr.msk.bf16.vlgmr.msra.gmra.mrb[0].mxu0 (!%p4379_p13), %vm561_vm0, %v826_v48 }
 0x2cb   : > { %v864_v49 = vpop.f32.mrb[0].mxu0 }
 0x2cc   : > { %v865_v50 = vadd.f32 %v5586_v26, %v864_v49  ;;  %v4802_v51 = vpop.f32.mrb[1].mxu0 }
 0x2cd   : > { %v867_v52 = vpop.f32.mrb[2].mxu0 }
 0x2ce   : > { %v868_v53 = vadd.f32 %v5586_v26, %v867_v52  ;;  %v4803_v54 = vpop.f32.mrb[3].mxu0  ;;  %v871_v55 = vmax.f32 %v865_v50, 0.0 }
 0x2d0   : > { %v872_v56 = vmax.f32 %v868_v53, 0.0 }
 0x2d2   : > { %v873_v57 = vpack.c.bf16 %v872_v56, %v871_v55 }
 0x2d4   : > { %v875_v58 = vrot.slane %v873_v57, 4 }
 0x2d6   : > { %878 = vst [vmem:[#allocation2 + $0x98] ss:$-4 sps:$4 sm:$0xff] %v875_v58  }
 0x2d7 PF: > { %v5302_v0 = vld [vmem:[%s6063_s5] sm:$0xff]   ;;  %v5304_v26 = vld [vmem:[%s6063_s5 + $0x8] sm:$0xff]   ;;  %v5306_v61 = vld [vmem:[%s6063_s5 + $0x10] sm:$0xff]   ;;  %vm1250_vm3 = vcmask 1043456   ;;  %vm896_vm4 = vsmask.f32 4352 }
 0x2d8   : > { %v5303_v59 = vld [vmem:[%s6063_s5 + $0x100] sm:$0xff]   ;;  %4804 = vmatprep.subr.bf16.mxu1 %v5302_v0  ;;  %v5305_v60 = vld [vmem:[%s6063_s5 + $0x108] sm:$0xff]   ;;  %v5307_v62 = vld [vmem:[%s6063_s5 + $0x110] sm:$0xff]   ;;  %vm1509_vm5 = vsmask.f32 3328 }
 0x2d9   : > { %4932 = vmatprep.subr.bf16.mxu0 %v5303_v59  ;;  %4805 = vmatpush3.bf16.msra.mxu1 %v5302_v0  ;;  %v5308_v63 = vld [vmem:[%s6063_s5 + $0x18] sm:$0xff]   ;;  %v5310_v2 = vld [vmem:[%s6063_s5 + $0x20] sm:$0xff]   ;;  %v5312_v4 = vld [vmem:[%s6063_s5 + $0x28] sm:$0xff]  }
 0x2da   : > { %4933 = vmatpush3.bf16.msra.mxu0 %v5303_v59  ;;  %4806 = vmatprep.subr.bf16.mxu1 %v5304_v26  ;;  %v5309_v1 = vld [vmem:[%s6063_s5 + $0x118] sm:$0xff]   ;;  %v5311_v3 = vld [vmem:[%s6063_s5 + $0x120] sm:$0xff]   ;;  %v5313_v5 = vld [vmem:[%s6063_s5 + $0x128] sm:$0xff]  }
 0x2db   : > { %4934 = vmatprep.subr.bf16.mxu0 %v5305_v60  ;;  %v880_v6 = vld [vmem:[#allocation2] sm:$0xf8]  ;;  %v881_v7 = vld [vmem:[#allocation2 + $0x8] sm:$0xf]  ;;  %v2234_v12 = vld [vmem:[#allocation2 + $0x10] sm:$0xf0] }
 0x2dc   : > { %v898_v8 = vshrl.u32 %v880_v6, 16  ;;  %v901_v9 = vshll.u32 %v880_v6, 16  ;;  %v906_v10 = vshrl.u32 %v881_v7, 16  ;;  %v909_v11 = vshll.u32 %v881_v7, 16  ;;  %v5314_v13 = vld [vmem:[%s6063_s5 + $0x30] sm:$0xff]   ;;  %v5316_v31 = vld [vmem:[%s6063_s5 + $0x38] sm:$0xff]  }
 0x2dd   : > { %4807 = vmatpush3.bf16.msra.mxu1 %v5304_v26  ;;  %v2235_v14 = vld [vmem:[#allocation2 + $0x18] sm:$0xf]  ;;  %v2266_v15 = vrot.slane %v2234_v12, 4  ;;  %v882_v16 = vld [vmem:[#allocation2 + $0x10] sm:$0xf8]  ;;  %v5318_v44 = vld [vmem:[%s6063_s5 + $0x40] sm:$0xff]  }
 0x2de   : > { %4935 = vmatpush3.bf16.msra.mxu0 %v5305_v60  ;;  %4808 = vmatprep.subr.bf16.mxu1 %v5306_v61  ;;  %v900_v17 = vrot.slane %v898_v8, 3  ;;  %v903_v18 = vrot.slane %v901_v9, 4  ;;  %v908_v19 = vrot.slane %v906_v10, 3  ;;  %v911_v20 = vrot.slane %v909_v11, 4  ;;  %v883_v21 = vld [vmem:[#allocation2 + $0x18] sm:$0xf] }
 0x2df   : > { %4936 = vmatprep.subr.bf16.mxu0 %v5307_v62  ;;  %v2267_v22 = vrot.slane %v2235_v14, 4  ;;  %v915_v23 = vshrl.u32 %v882_v16, 16  ;;  %v918_v24 = vshll.u32 %v882_v16, 16  ;;  %v923_v25 = vshrl.u32 %v883_v21, 16  ;;  %v5315_v27 = vld [vmem:[%s6063_s5 + $0x130] sm:$0xff]   ;;  %v5317_v37 = vld [vmem:[%s6063_s5 + $0x138] sm:$0xff]  }
 0x2e0   : > { %v904_v28 = vor.u32 %v903_v18, %v900_v17  ;;  %v912_v29 = vor.u32 %v911_v20, %v908_v19  ;;  %v926_v30 = vshll.u32 %v883_v21, 16  ;;  %v2236_v36 = vld [vmem:[#allocation2 + $0x20] sm:$0xf0]  ;;  %v2237_v40 = vld [vmem:[#allocation2 + $0x28] sm:$0xf]  ;;  %v5322_v17 = vld [vmem:[%s6063_s5 + $0x50] sm:$0xff]  }
 0x2e1   : > { %4809 = vmatpush3.bf16.msra.mxu1 %v5306_v61  ;;  %v2268_v32 = vsel %vm1250_vm3, %v2266_v15, %v2267_v22  ;;  %v917_v33 = vrot.slane %v915_v23, 3  ;;  %v920_v34 = vrot.slane %v918_v24, 4  ;;  %v925_v35 = vrot.slane %v923_v25, 3  ;;  %v884_v41 = vld [vmem:[#allocation2 + $0x20] sm:$0xf8]  ;;  %v5323_v20 = vld [vmem:[%s6063_s5 + $0x150] sm:$0xff]  }
 0x2e2   : > { %4937 = vmatpush3.bf16.msra.mxu0 %v5307_v62  ;;  %4810 = vmatprep.subr.bf16.mxu1 %v5308_v63  ;;  %v913_v38 = vsel %vm896_vm4, %v904_v28, %v912_v29  ;;  %v928_v39 = vrot.slane %v926_v30, 4  ;;  %v885_v45 = vld [vmem:[#allocation2 + $0x28] sm:$0xf]  ;;  %v932_v46 = vshrl.u32 %v884_v41, 16  ;;  %v935_v47 = vshll.u32 %v884_v41, 16  ;;  %v5319_v50 = vld [vmem:[%s6063_s5 + $0x140] sm:$0xff]  }
 0x2e3   : > { %4938 = vmatprep.subr.bf16.mxu0 %v5309_v1  ;;  %4948 = vmatprep.mubr.bf16.mxu0 %v2268_v32  ;;  %v921_v42 = vor.u32 %v920_v34, %v917_v33  ;;  %v2238_v48 = vld [vmem:[#allocation2 + $0x30] sm:$0xf0]  ;;  %v2269_v49 = vrot.slane %v2236_v36, 4  ;;  %v940_v51 = vshrl.u32 %v885_v45, 16  ;;  %v943_v52 = vshll.u32 %v885_v45, 16 }
 0x2e4   : > { %4820 = vmatprep.mubr.bf16.mxu1 %v913_v38  ;;  %v929_v43 = vor.u32 %v928_v39, %v925_v35  ;;  %v2239_v53 = vld [vmem:[#allocation2 + $0x38] sm:$0xf]  ;;  %v2270_v54 = vrot.slane %v2237_v40, 4  ;;  %v934_v55 = vrot.slane %v932_v46, 3  ;;  %v937_v56 = vrot.slane %v935_v47, 4 }
 0x2e5   : > { %4811 = vmatpush3.bf16.msra.mxu1 %v5308_v63  ;;  %v2272_v57 = vrot.slane %v2238_v48, 4  ;;  %v886_v58 = vld [vmem:[#allocation2 + $0x30] sm:$0xf8]  ;;  %v942_v0 = vrot.slane %v940_v51, 3  ;;  %v945_v59 = vrot.slane %v943_v52, 4  ;;  %v5320_v63 = vld [vmem:[%s6063_s5 + $0x48] sm:$0xff]  }
 0x2e6   : > { %4939 = vmatpush3.bf16.msra.mxu0 %v5309_v1  ;;  %4812 = vmatprep.subr.bf16.mxu1 %v5310_v2  ;;  %v887_v26 = vld [vmem:[#allocation2 + $0x38] sm:$0xf]  ;;  %v949_v60 = vshrl.u32 %v886_v58, 16  ;;  %v952_v61 = vshll.u32 %v886_v58, 16  ;;  %v930_v62 = vsel %vm896_vm4, %v921_v42, %v929_v43  ;;  %v938_v1 = vor.u32 %v937_v56, %v934_v55  ;;  %v2240_v9 = vld [vmem:[#allocation2 + $0x40] sm:$0xf0] }
 0x2e7   : > { %4940 = vmatprep.subr.bf16.mxu0 %v5311_v3  ;;  %v2273_v6 = vrot.slane %v2239_v53, 4  ;;  %v2271_v10 = vsel %vm1250_vm3, %v2269_v49, %v2270_v54  ;;  %v2275_v19 = vrot.slane %v2240_v9, 4  ;;  %v888_v21 = vld [vmem:[#allocation2 + $0x40] sm:$0xf8]  ;;  %v889_v22 = vld [vmem:[#allocation2 + $0x48] sm:$0xf] }
 0x2e8   : > { %v951_v7 = vrot.slane %v949_v60, 3  ;;  %v954_v8 = vrot.slane %v952_v61, 4  ;;  %v966_v24 = vshrl.u32 %v888_v21, 16  ;;  %v969_v25 = vshll.u32 %v888_v21, 16  ;;  %v2242_v28 = vld [vmem:[#allocation2 + $0x50] sm:$0xf0] }
 0x2e9   : > { %4813 = vmatpush3.bf16.msra.mxu1 %v5310_v2  ;;  %v957_v2 = vshrl.u32 %v887_v26, 16  ;;  %v2274_v18 = vsel %vm1250_vm3, %v2272_v57, %v2273_v6  ;;  %v977_v30 = vshll.u32 %v889_v22, 16  ;;  %v2278_v32 = vrot.slane %v2242_v28, 4  ;;  %v890_v33 = vld [vmem:[#allocation2 + $0x50] sm:$0xf8]  ;;  %v5325_v48 = vld [vmem:[%s6063_s5 + $0x158] sm:$0xff]  }
 0x2ea   : > { %4941 = vmatpush3.bf16.msra.mxu0 %v5311_v3  ;;  %4814 = vmatprep.subr.bf16.mxu1 %v5312_v4  ;;  %v960_v3 = vshll.u32 %v887_v26, 16  ;;  %v955_v14 = vor.u32 %v954_v8, %v951_v7  ;;  %v968_v34 = vrot.slane %v966_v24, 3  ;;  %v971_v35 = vrot.slane %v969_v25, 4  ;;  %v891_v38 = vld [vmem:[#allocation2 + $0x58] sm:$0xf]  ;;  %v5326_v55 = vld [vmem:[%s6063_s5 + $0x60] sm:$0xff]  }
 0x2eb   : > { %4942 = vmatprep.subr.bf16.mxu0 %v5313_v5  ;;  %v959_v11 = vrot.slane %v957_v2, 3  ;;  %v979_v39 = vrot.slane %v977_v30, 4  ;;  %v983_v40 = vshrl.u32 %v890_v33, 16  ;;  %v986_v41 = vshll.u32 %v890_v33, 16  ;;  %v2244_v47 = vld [vmem:[#allocation2 + $0x60] sm:$0xf0] }
 0x2ec   : > { %v962_v12 = vrot.slane %v960_v3, 4  ;;  %v991_v42 = vshrl.u32 %v891_v38, 16  ;;  %v972_v45 = vor.u32 %v971_v35, %v968_v34  ;;  %v994_v46 = vshll.u32 %v891_v38, 16  ;;  %v2245_v53 = vld [vmem:[#allocation2 + $0x68] sm:$0xf]  ;;  %v5327_v26 = vld [vmem:[%s6063_s5 + $0x160] sm:$0xff]  }
 0x2ed   : > { %4815 = vmatpush3.bf16.msra.mxu1 %v5312_v4  ;;  %v5321_v4 = vld [vmem:[%s6063_s5 + $0x148] sm:$0xff]   ;;  %v988_v51 = vrot.slane %v986_v41, 4  ;;  %v2281_v56 = vrot.slane %v2244_v47, 4  ;;  %v2282_v57 = vrot.slane %v2245_v53, 4  ;;  %v892_v61 = vld [vmem:[#allocation2 + $0x60] sm:$0xf8] }
 0x2ee   : > { %4943 = vmatpush3.bf16.msra.mxu0 %v5313_v5  ;;  %4816 = vmatprep.subr.bf16.mxu1 %v5314_v13  ;;  %v946_v5 = vor.u32 %v945_v59, %v942_v0  ;;  %v963_v16 = vor.u32 %v962_v12, %v959_v11  ;;  %v993_v52 = vrot.slane %v991_v42, 3  ;;  %v996_v54 = vrot.slane %v994_v46, 4  ;;  %v2246_v2 = vld [vmem:[#allocation2 + $0x70] sm:$0xf0]  ;;  %v2247_v7 = vld [vmem:[#allocation2 + $0x78] sm:$0xf] }
 0x2ef   : > { %4944 = vmatprep.subr.bf16.mxu0 %v5315_v27  ;;  %v2283_v3 = vsel %vm1250_vm3, %v2281_v56, %v2282_v57  ;;  %v2284_v8 = vrot.slane %v2246_v2, 4  ;;  %v5330_v28 = vld [vmem:[%s6063_s5 + $0x70] sm:$0xff]   ;;  %v2249_v30 = vld [vmem:[#allocation2 + $0x88] sm:$0xf]  ;;  %v5332_v42 = vld [vmem:[%s6063_s5 + $0x78] sm:$0xff]  }
 0x2f0   : > { %v947_v15 = vsel %vm896_vm4, %v938_v1, %v946_v5  ;;  %v964_v29 = vsel %vm896_vm4, %v955_v14, %v963_v16  ;;  %v997_v60 = vor.u32 %v996_v54, %v993_v52  ;;  %v1003_v1 = vshll.u32 %v892_v61, 16  ;;  %v894_v14 = vld [vmem:[#allocation2 + $0x70] sm:$0xf8] }
 0x2f1   : > { %4817 = vmatpush3.bf16.msra.mxu1 %v5314_v13  ;;  %v2241_v13 = vld [vmem:[#allocation2 + $0x48] sm:$0xf]  ;;  %v2288_v34 = vrot.slane %v2249_v30, 4  ;;  %v5331_v38 = vld [vmem:[%s6063_s5 + $0x170] sm:$0xff]  }
 0x2f2   : > { %4945 = vmatpush3.bf16.msra.mxu0 %v5315_v27  ;;  %4818 = vmatprep.subr.bf16.mxu1 %v5316_v31  ;;  %v2276_v23 = vrot.slane %v2241_v13, 4  ;;  %v974_v27 = vshrl.u32 %v889_v22, 16  ;;  %v1005_v12 = vrot.slane %v1003_v1, 4  ;;  %v2285_v13 = vrot.slane %v2247_v7, 4  ;;  %v2508_v46 = vld [vmem:[#allocation2 + $0x10] sm:$0xf0] }
 0x2f3   : > { %4946 = vmatprep.subr.bf16.mxu0 %v5317_v37  ;;  %v2511_v1 = vld [vmem:[#allocation2 + $0x28] sm:$0x1f] }
 0x2f4   : > { %v976_v36 = vrot.slane %v974_v27, 3  ;;  %v2277_v43 = vsel %vm1250_vm3, %v2275_v19, %v2276_v23  ;;  %v1020_v19 = vshll.u32 %v894_v14, 16  ;;  %v2286_v24 = vsel %vm1250_vm3, %v2284_v8, %v2285_v13 }
 0x2f5   : > { %4819 = vmatpush3.bf16.msra.mxu1 %v5316_v31  ;;  %v2243_v31 = vld [vmem:[#allocation2 + $0x58] sm:$0xf] }
 0x2f6   : > { %4947 = vmatpush3.bf16.msra.mxu0 %v5317_v37  ;;  %4836 = vmatprep.subr.bf16.mxu1 %v5318_v44  ;;  %v2279_v37 = vrot.slane %v2243_v31, 4  ;;  %v980_v49 = vor.u32 %v979_v39, %v976_v36  ;;  %v1022_v27 = vrot.slane %v1020_v19, 4  ;;  %v1218_v39 = vld [vmem:[#allocation2] sm:$0xf0]  ;;  %v5337_v19 = vld [vmem:[%s6063_s5 + $0x188] sm:$0xff]  }
 0x2f7   : > { %4964 = vmatprep.subr.bf16.mxu0 %v5319_v50 }
 0x2f8   : > { %4821 = vmatmul.mubr.bf16.vlgmr.msra.gmra.mrb[0].mxu1 %v930_v62  ;;  %v981_v58 = vsel %vm896_vm4, %v972_v45, %v980_v49  ;;  %v2280_v0 = vsel %vm1250_vm3, %v2278_v32, %v2279_v37  ;;  %v893_v62 = vld [vmem:[#allocation2 + $0x68] sm:$0xf]  ;;  %v2525_v49 = vshrl.u32 %v2508_v46, 16 }
 0x2f9   : > { %4949 = vmatmul.mubr.bf16.vlgmr.msra.gmra.mrb[0].mxu0 %v2271_v10  ;;  %4837 = vmatpush3.bf16.msra.mxu1 %v5318_v44  ;;  %v5324_v44 = vld [vmem:[%s6063_s5 + $0x58] sm:$0xff]   ;;  %v1008_v5 = vshrl.u32 %v893_v62, 16  ;;  %v1011_v6 = vshll.u32 %v893_v62, 16  ;;  %v5329_v10 = vld [vmem:[%s6063_s5 + $0x168] sm:$0xff]   ;;  %v5335_v62 = vld [vmem:[%s6063_s5 + $0x180] sm:$0xff]  }
 0x2fa   : > { %4965 = vmatpush3.bf16.msra.mxu0 %v5319_v50  ;;  %4838 = vmatprep.subr.bf16.mxu1 %v5320_v63  ;;  %v985_v50 = vrot.slane %v983_v40, 3  ;;  %v1219_v40 = vld [vmem:[#allocation2 + $0x8] sm:$0xf]  ;;  %v2527_v56 = vrot.slane %v2525_v49, 4 }
 0x2fb   : > { %4966 = vmatprep.subr.bf16.mxu0 %v5321_v4  ;;  %4824 = vmatprep.mubr.bf16.mxu1 %v947_v15  ;;  %v1010_v15 = vrot.slane %v1008_v5, 3  ;;  %v1013_v16 = vrot.slane %v1011_v6, 4  ;;  %v1252_v45 = vrot.slane %v1219_v40, 4  ;;  %v2550_v5 = vshrl.u32 %v2511_v1, 16  ;;  %v2515_v40 = vld [vmem:[#allocation2 + $0x48] sm:$0x1f] }
 0x2fc   : > { %4952 = vmatprep.mubr.bf16.mxu0 %v2274_v18  ;;  %v989_v59 = vor.u32 %v988_v51, %v985_v50  ;;  %v1017_v18 = vshrl.u32 %v894_v14, 16  ;;  %v2528_v50 = vshll.u32 %v2508_v46, 16  ;;  %v1220_v51 = vld [vmem:[#allocation2 + $0x10] sm:$0xf0]  ;;  %v2553_v6 = vshll.u32 %v2511_v1, 16 }
 0x2fd   : > { %4839 = vmatpush3.bf16.msra.mxu1 %v5320_v63  ;;  %v1000_v63 = vshrl.u32 %v892_v61, 16  ;;  %v1014_v23 = vor.u32 %v1013_v16, %v1010_v15  ;;  %v2510_v61 = vld [vmem:[#allocation2 + $0x20] sm:$0xf0]  ;;  %v1223_v16 = vld [vmem:[#allocation2 + $0x28] sm:$0xf] }
 0x2fe   : > { %4967 = vmatpush3.bf16.msra.mxu0 %v5321_v4  ;;  %4840 = vmatprep.subr.bf16.mxu1 %v5322_v17  ;;  %v5328_v4 = vld [vmem:[%s6063_s5 + $0x68] sm:$0xff]   ;;  %v998_v9 = vsel %vm896_vm4, %v989_v59, %v997_v60  ;;  %v1019_v25 = vrot.slane %v1017_v18, 3  ;;  %v2530_v57 = vrot.slane %v2528_v50, 5  ;;  %v5334_v60 = vld [vmem:[%s6063_s5 + $0x80] sm:$0xff]   ;;  %v2542_v2 = vshrl.u32 %v2510_v61, 16 }
 0x2ff   : > { %4968 = vmatprep.subr.bf16.mxu0 %v5323_v20  ;;  %v1002_v11 = vrot.slane %v1000_v63, 3  ;;  %v2555_v13 = vrot.slane %v2553_v6, 5  ;;  %v1222_v15 = vld [vmem:[#allocation2 + $0x20] sm:$0xf0]  ;;  %v1228_v1 = vld [vmem:[#allocation2 + $0x50] sm:$0xf0] }
 0x300   : > { %4825 = vmatmul.mubr.bf16.gmra.mrb[4].mxu1 %v964_v29  ;;  %v2248_v29 = vld [vmem:[#allocation2 + $0x80] sm:$0xf0]  ;;  %v1023_v36 = vor.u32 %v1022_v27, %v1019_v25  ;;  %v2531_v63 = vor.u32 %v2530_v57, %v2527_v56  ;;  %v2544_v7 = vrot.slane %v2542_v2, 4  ;;  %v1227_v57 = vld [vmem:[#allocation2 + $0x48] sm:$0xf]  ;;  %v1266_v6 = vrot.slane %v1228_v1, 4 }
 0x301   : > { %4953 = vmatmul.mubr.bf16.gmra.mrb[4].mxu0 %v2277_v43  ;;  %4841 = vmatpush3.bf16.msra.mxu1 %v5322_v17  ;;  %v895_v17 = vld [vmem:[#allocation2 + $0x78] sm:$0xf]  ;;  %v2287_v33 = vrot.slane %v2248_v29, 4  ;;  %v5338_v29 = vld [vmem:[%s6063_s5 + $0x90] sm:$0xff]   ;;  %v1226_v56 = vld [vmem:[#allocation2 + $0x40] sm:$0xf0] }
 0x302   : > { %4969 = vmatpush3.bf16.msra.mxu0 %v5323_v20  ;;  %4842 = vmatprep.subr.bf16.mxu1 %v5324_v44  ;;  %v1006_v20 = vor.u32 %v1005_v12, %v1002_v11  ;;  %v1025_v21 = vshrl.u32 %v895_v17, 16  ;;  %v1028_v22 = vshll.u32 %v895_v17, 16  ;;  %v5333_v43 = vld [vmem:[%s6063_s5 + $0x178] sm:$0xff]   ;;  %v2552_v12 = vrot.slane %v2550_v5, 4  ;;  %v2512_v17 = vld [vmem:[#allocation2 + $0x30] sm:$0xf0] }
 0x303   : > { %4970 = vmatprep.subr.bf16.mxu0 %v5325_v48  ;;  %4828 = vmatprep.mubr.bf16.mxu1 %v981_v58  ;;  %v2289_v47 = vsel %vm1250_vm3, %v2287_v33, %v2288_v34  ;;  %v1254_v58 = vrot.slane %v1220_v51, 4  ;;  %v1225_v33 = vld [vmem:[#allocation2 + $0x38] sm:$0xf] }
 0x304   : > { %4956 = vmatprep.mubr.bf16.mxu0 %v2280_v0  ;;  %v1027_v31 = vrot.slane %v1025_v21, 3  ;;  %v1030_v32 = vrot.slane %v1028_v22, 4  ;;  %v1015_v35 = vsel %vm896_vm4, %v1006_v20, %v1014_v23  ;;  %v2556_v18 = vor.u32 %v2555_v13, %v2552_v12  ;;  %v2513_v22 = vld [vmem:[#allocation2 + $0x38] sm:$0x1f] }
 0x305   : > { %4843 = vmatpush3.bf16.msra.mxu1 %v5324_v44  ;;  %v1251_v44 = vrot.slane %v1218_v39, 4  ;;  %v1257_v20 = vrot.slane %v1222_v15, 4  ;;  %v1258_v21 = vrot.slane %v1223_v16, 4  ;;  %v2559_v23 = vshrl.u32 %v2512_v17, 16  ;;  %v2514_v39 = vld [vmem:[#allocation2 + $0x40] sm:$0xf0] }
 0x306   : > { %4971 = vmatpush3.bf16.msra.mxu0 %v5325_v48  ;;  %4844 = vmatprep.subr.bf16.mxu1 %v5326_v55  ;;  %v1031_v37 = vor.u32 %v1030_v32, %v1027_v31  ;;  %v2509_v48 = vld [vmem:[#allocation2 + $0x18] sm:$0x1f]  ;;  %v2567_v25 = vshrl.u32 %v2513_v22, 16  ;;  %v2570_v27 = vshll.u32 %v2513_v22, 16  ;;  %v2579_v46 = vshll.u32 %v2514_v39, 16  ;;  %v5344_v16 = vld [vmem:[%s6063_s5 + $0xa8] sm:$0xff]  }
 0x307   : > { %4972 = vmatprep.subr.bf16.mxu0 %v5327_v26  ;;  %v1253_v52 = vsel %vm1250_vm3, %v1251_v44, %v1252_v45  ;;  %v2533_v53 = vshrl.u32 %v2509_v48, 16  ;;  %v2536_v54 = vshll.u32 %v2509_v48, 16  ;;  %v1259_v31 = vsel %vm1250_vm3, %v1257_v20, %v1258_v21  ;;  %v5339_v44 = vld [vmem:[%s6063_s5 + $0x190] sm:$0xff]   ;;  %v5340_v51 = vld [vmem:[%s6063_s5 + $0x98] sm:$0xff]   ;;  %v2518_v15 = vld [vmem:[#allocation2 + $0x60] sm:$0xf0] }
 0x308   : > { %4829 = vmatmul.mubr.bf16.gmra.mrb[8].mxu1 %v998_v9  ;;  %v1032_v41 = vsel %vm896_vm4, %v1023_v36, %v1031_v37  ;;  %v5336_v9 = vld [vmem:[%s6063_s5 + $0x88] sm:$0xff]   ;;  %v2561_v32 = vrot.slane %v2559_v23, 4  ;;  %v2569_v36 = vrot.slane %v2567_v25, 4  ;;  %v2572_v37 = vrot.slane %v2570_v27, 5  ;;  %v1229_v5 = vld [vmem:[#allocation2 + $0x58] sm:$0xf] }
 0x309   : > { %4957 = vmatmul.mubr.bf16.gmra.mrb[8].mxu0 %v2283_v3  ;;  %4845 = vmatpush3.bf16.msra.mxu1 %v5326_v55  ;;  %v1221_v55 = vld [vmem:[#allocation2 + $0x18] sm:$0xf]  ;;  %v2535_v59 = vrot.slane %v2533_v53, 4  ;;  %v2545_v3 = vshll.u32 %v2510_v61, 16  ;;  %v2587_v48 = vshll.u32 %v2515_v40, 16  ;;  %v1264_v61 = vrot.slane %v1227_v57, 4 }
 0x30a   : > { %4973 = vmatpush3.bf16.msra.mxu0 %v5327_v26  ;;  %4846 = vmatprep.subr.bf16.mxu1 %v5328_v4  ;;  %v1255_v0 = vrot.slane %v1221_v55, 4  ;;  %v2538_v26 = vrot.slane %v2536_v54, 5  ;;  %v5341_v55 = vld [vmem:[%s6063_s5 + $0x198] sm:$0xff]   ;;  %v2613_v20 = vshll.u32 %v2518_v15, 16  ;;  %v5345_v25 = vld [vmem:[%s6063_s5 + $0x1a8] sm:$0xff]  }
 0x30b   : > { %4974 = vmatprep.subr.bf16.mxu0 %v5329_v10  ;;  %4832 = vmatprep.mubr.bf16.mxu1 %v1015_v35  ;;  %v2547_v8 = vrot.slane %v2545_v3, 5  ;;  %v2589_v54 = vrot.slane %v2587_v48, 5 }
 0x30c   : > { %4960 = vmatprep.mubr.bf16.mxu0 %v2286_v24  ;;  %v1256_v11 = vsel %vm1250_vm3, %v1254_v58, %v1255_v0  ;;  %v2562_v24 = vshll.u32 %v2512_v17, 16  ;;  %v1263_v58 = vrot.slane %v1226_v56, 4  ;;  %v2516_v0 = vld [vmem:[#allocation2 + $0x50] sm:$0xf0]  ;;  %v2522_v56 = vld [vmem:[#allocation2 + $0x80] sm:$0xf0] }
 0x30d   : > { %4847 = vmatpush3.bf16.msra.mxu1 %v5328_v4  ;;  %v2539_v4 = vor.u32 %v2538_v26, %v2535_v59  ;;  %v2548_v14 = vor.u32 %v2547_v8, %v2544_v7  ;;  %v5342_v59 = vld [vmem:[%s6063_s5 + $0xa0] sm:$0xff]   ;;  %v2596_v2 = vshll.u32 %v2516_v0, 16 }
 0x30e   : > { %4975 = vmatpush3.bf16.msra.mxu0 %v5329_v10  ;;  %4848 = vmatprep.subr.bf16.mxu1 %v5330_v28  ;;  %v2564_v35 = vrot.slane %v2562_v24, 5  ;;  %v5343_v7 = vld [vmem:[%s6063_s5 + $0x1a0] sm:$0xff]  }
 0x30f   : > { %4976 = vmatprep.subr.bf16.mxu0 %v5331_v38  ;;  %v2540_v10 = vsel %vm1509_vm5, %v2531_v63, %v2539_v4  ;;  %v2557_v30 = vsel %vm1509_vm5, %v2548_v14, %v2556_v18  ;;  %v2593_v63 = vshrl.u32 %v2516_v0, 16  ;;  %v2598_v12 = vrot.slane %v2596_v2, 5  ;;  %v2519_v18 = vld [vmem:[#allocation2 + $0x68] sm:$0x1f]  ;;  %v5348_v2 = vld [vmem:[%s6063_s5 + $0xb8] sm:$0xff]  }
 0x310   : > { %4833 = vmatmul.mubr.bf16.gmra.mrb[12].mxu1 %v1032_v41  ;;  %v2565_v41 = vor.u32 %v2564_v35, %v2561_v32  ;;  %v2618_v23 = vshrl.u32 %v2519_v18, 16  ;;  %v2621_v24 = vshll.u32 %v2519_v18, 16  ;;  %v1230_v32 = vld [vmem:[#allocation2 + $0x60] sm:$0xf0]  ;;  %v2644_v0 = vshrl.u32 %v2522_v56, 16 }
 0x311   : > { %4961 = vmatmul.mubr.bf16.gmra.mrb[12].mxu0 %v2289_v47  ;;  %4849 = vmatpush3.bf16.msra.mxu1 %v5330_v28  ;;  %v1224_v28 = vld [vmem:[#allocation2 + $0x30] sm:$0xf0]  ;;  %v2584_v47 = vshrl.u32 %v2515_v40, 16  ;;  %v1269_v35 = vrot.slane %v1230_v32, 4  ;;  %v2521_v40 = vld [vmem:[#allocation2 + $0x78] sm:$0x1f] }
 0x312   : > { %4977 = vmatpush3.bf16.msra.mxu0 %v5331_v38  ;;  %4850 = vmatprep.subr.bf16.mxu1 %v5332_v42  ;;  %v1260_v34 = vrot.slane %v1224_v28, 4  ;;  %v1261_v38 = vrot.slane %v1225_v33, 4  ;;  %v2615_v28 = vrot.slane %v2613_v20, 5 }
 0x313   : > { %4978 = vmatprep.subr.bf16.mxu0 %v5333_v43  ;;  %4852 = vmatprep.mubr.bf16.mxu1 %v1253_v52  ;;  %v2581_v52 = vrot.slane %v2579_v46, 5  ;;  %v2586_v53 = vrot.slane %v2584_v47, 4  ;;  %v1232_v46 = vld [vmem:[#allocation2 + $0x70] sm:$0xf0]  ;;  %v1233_v47 = vld [vmem:[#allocation2 + $0x78] sm:$0xf] }
 0x314   : > { %4980 = vmatprep.mubr.bf16.mxu0 %v2540_v10  ;;  %v1262_v45 = vsel %vm1250_vm3, %v1260_v34, %v1261_v38  ;;  %v2595_v10 = vrot.slane %v2593_v63, 4  ;;  %v1231_v34 = vld [vmem:[#allocation2 + $0x68] sm:$0xf]  ;;  %v2646_v63 = vrot.slane %v2644_v0, 4 }
 0x315   : > { %4851 = vmatpush3.bf16.msra.mxu1 %v5332_v42  ;;  %v2573_v42 = vor.u32 %v2572_v37, %v2569_v36  ;;  %v2520_v36 = vld [vmem:[#allocation2 + $0x70] sm:$0xf0] }
 0x316   : > { %4979 = vmatpush3.bf16.msra.mxu0 %v5333_v43  ;;  %4868 = vmatprep.subr.bf16.mxu1 %v5334_v60  ;;  %v2576_v43 = vshrl.u32 %v2514_v39, 16  ;;  %v2599_v21 = vor.u32 %v2598_v12, %v2595_v10  ;;  %v5346_v37 = vld [vmem:[%s6063_s5 + $0xb0] sm:$0xff]   ;;  %v1270_v39 = vrot.slane %v1231_v34, 4  ;;  %v2879_v10 = vld [vmem:[#allocation2 + $0x20] sm:$0xf8] }
 0x317   : > { %4996 = vmatprep.subr.bf16.mxu0 %v5335_v62  ;;  %v2574_v49 = vsel %vm1509_vm5, %v2565_v41, %v2573_v42  ;;  %v2627_v41 = vshrl.u32 %v2520_v36, 16  ;;  %v2630_v42 = vshll.u32 %v2520_v36, 16  ;;  %v2896_v18 = vshrl.u32 %v2879_v10, 16 }
 0x318   : > { %4853 = vmatmul.mubr.bf16.vlgmr.msra.gmra.mrb[0].mxu1 %v1256_v11  ;;  %v2578_v50 = vrot.slane %v2576_v43, 4  ;;  %v1267_v11 = vrot.slane %v1229_v5, 4  ;;  %v5347_v43 = vld [vmem:[%s6063_s5 + $0x1b0] sm:$0xff]  }
 0x319   : > { %4869 = vmatpush3.bf16.msra.mxu1 %v5334_v60  ;;  %4981 = vmatmul.mubr.bf16.vlgmr.msra.gmra.mrb[0].mxu0 %v2557_v30  ;;  %v2590_v60 = vor.u32 %v2589_v54, %v2586_v53  ;;  %v2620_v30 = vrot.slane %v2618_v23, 4  ;;  %v1272_v54 = vrot.slane %v1232_v46, 4 }
 0x31a   : > { %4870 = vmatprep.subr.bf16.mxu1 %v5336_v9  ;;  %4997 = vmatpush3.bf16.msra.mxu0 %v5335_v62  ;;  %v2582_v26 = vor.u32 %v2581_v52, %v2578_v50  ;;  %v2517_v62 = vld [vmem:[#allocation2 + $0x58] sm:$0x1f]  ;;  %v1268_v17 = vsel %vm1250_vm3, %v1266_v6, %v1267_v11  ;;  %v2629_v50 = vrot.slane %v2627_v41, 4  ;;  %v2881_v41 = vld [vmem:[#allocation2 + $0x30] sm:$0xf8] }
 0x31b   : > { %4856 = vmatprep.mubr.bf16.mxu1 %v1259_v31  ;;  %4998 = vmatprep.subr.bf16.mxu0 %v5337_v19  ;;  %v2601_v3 = vshrl.u32 %v2517_v62, 16  ;;  %v2604_v4 = vshll.u32 %v2517_v62, 16  ;;  %v2623_v31 = vrot.slane %v2621_v24, 5  ;;  %v2913_v46 = vshrl.u32 %v2881_v41, 16 }
 0x31c   : > { %4984 = vmatprep.mubr.bf16.mxu0 %v2574_v49  ;;  %v2591_v8 = vsel %vm1509_vm5, %v2582_v26, %v2590_v60  ;;  %v1271_v49 = vsel %vm1250_vm3, %v1269_v35, %v1270_v39 }
 0x31d   : > { %4871 = vmatpush3.bf16.msra.mxu1 %v5336_v9  ;;  %v1265_v9 = vsel %vm1250_vm3, %v1263_v58, %v1264_v61  ;;  %v2603_v13 = vrot.slane %v2601_v3, 4  ;;  %v2606_v14 = vrot.slane %v2604_v4, 5  ;;  %v2624_v38 = vor.u32 %v2623_v31, %v2620_v30  ;;  %v2523_v58 = vld [vmem:[#allocation2 + $0x88] sm:$0x1f]  ;;  %v5349_v3 = vld [vmem:[%s6063_s5 + $0x1b8] sm:$0xff]  }
 0x31e   : > { %4872 = vmatprep.subr.bf16.mxu1 %v5338_v29  ;;  %4999 = vmatpush3.bf16.msra.mxu0 %v5337_v19  ;;  %v2610_v19 = vshrl.u32 %v2518_v15, 16  ;;  %v2652_v61 = vshrl.u32 %v2523_v58, 16  ;;  %v2655_v62 = vshll.u32 %v2523_v58, 16  ;;  %v2880_v15 = vld [vmem:[#allocation2 + $0x28] sm:$0xf]  ;;  %v2898_v30 = vrot.slane %v2896_v18, 3 }
 0x31f   : > { %5000 = vmatprep.subr.bf16.mxu0 %v5339_v44  ;;  %v2607_v22 = vor.u32 %v2606_v14, %v2603_v13  ;;  %v2904_v20 = vshrl.u32 %v2880_v15, 16  ;;  %v2907_v34 = vshll.u32 %v2880_v15, 16  ;;  %v5354_v15 = vld [vmem:[%s6063_s5 + $0xd0] sm:$0xff]  }
 0x320   : > { %4857 = vmatmul.mubr.bf16.gmra.mrb[4].mxu1 %v1262_v45  ;;  %v2612_v27 = vrot.slane %v2610_v19, 4  ;;  %v2638_v45 = vshll.u32 %v2521_v40, 16  ;;  %v2654_v5 = vrot.slane %v2652_v61, 4  ;;  %v2657_v6 = vrot.slane %v2655_v62, 5 }
 0x321   : > { %4873 = vmatpush3.bf16.msra.mxu1 %v5338_v29  ;;  %4985 = vmatmul.mubr.bf16.gmra.mrb[4].mxu0 %v2591_v8  ;;  %v2608_v29 = vsel %vm1509_vm5, %v2599_v21, %v2607_v22  ;;  %v1493_v8 = vld [vmem:[#allocation2] sm:$0xf0]  ;;  %v2899_v19 = vshll.u32 %v2879_v10, 16  ;;  %v1495_v21 = vld [vmem:[#allocation2 + $0x10] sm:$0xf0]  ;;  %v2906_v32 = vrot.slane %v2904_v20, 3 }
 0x322   : > { %4874 = vmatprep.subr.bf16.mxu1 %v5340_v51  ;;  %5001 = vmatpush3.bf16.msra.mxu0 %v5339_v44  ;;  %v2616_v33 = vor.u32 %v2615_v28, %v2612_v27  ;;  %v2635_v44 = vshrl.u32 %v2521_v40, 16  ;;  %v2640_v53 = vrot.slane %v2638_v45, 5  ;;  %v2658_v11 = vor.u32 %v2657_v6, %v2654_v5  ;;  %v1496_v27 = vld [vmem:[#allocation2 + $0x18] sm:$0x1f]  ;;  %v5804_v28 = vld [vmem:[%s6063_s5 + $0x1c0] sm:$0xff]  }
 0x323   : > { %5002 = vmatprep.subr.bf16.mxu0 %v5341_v55  ;;  %4860 = vmatprep.mubr.bf16.mxu1 %v1265_v9  ;;  %v1494_v9 = vld [vmem:[#allocation2 + $0x8] sm:$0x1f]  ;;  %v1511_v12 = vshrl.u32 %v1493_v8, 16  ;;  %v1514_v13 = vshll.u32 %v1493_v8, 16  ;;  %v2901_v31 = vrot.slane %v2899_v19, 4  ;;  %v1528_v35 = vshrl.u32 %v1495_v21, 16 }
 0x324   : > { %4988 = vmatprep.mubr.bf16.mxu0 %v2608_v29  ;;  %v2625_v48 = vsel %vm1509_vm5, %v2616_v33, %v2624_v38  ;;  %v2637_v52 = vrot.slane %v2635_v44, 4  ;;  %v1519_v14 = vshrl.u32 %v1494_v9, 16  ;;  %v1531_v36 = vshll.u32 %v1495_v21, 16 }
 0x325   : > { %4875 = vmatpush3.bf16.msra.mxu1 %v5340_v51  ;;  %v2632_v51 = vrot.slane %v2630_v42, 5  ;;  %v1513_v23 = vrot.slane %v1511_v12, 4  ;;  %v1516_v24 = vrot.slane %v1514_v13, 5  ;;  %v2902_v38 = vor.u32 %v2901_v31, %v2898_v30  ;;  %v2882_v42 = vld [vmem:[#allocation2 + $0x38] sm:$0xf] }
 0x326   : > { %4876 = vmatprep.subr.bf16.mxu1 %v5342_v59  ;;  %5003 = vmatpush3.bf16.msra.mxu0 %v5341_v55  ;;  %v1273_v55 = vrot.slane %v1233_v47, 4  ;;  %v2641_v26 = vor.u32 %v2640_v53, %v2637_v52  ;;  %v1536_v39 = vshrl.u32 %v1496_v27, 16  ;;  %v1539_v40 = vshll.u32 %v1496_v27, 16  ;;  %v2885_v30 = vld [vmem:[#allocation2 + $0x50] sm:$0xf8] }
 0x327   : > { %5004 = vmatprep.subr.bf16.mxu0 %v5343_v7  ;;  %v2633_v57 = vor.u32 %v2632_v51, %v2629_v50  ;;  %v1517_v33 = vor.u32 %v1516_v24, %v1513_v23  ;;  %v1530_v44 = vrot.slane %v1528_v35, 4  ;;  %v1533_v45 = vrot.slane %v1531_v36, 5  ;;  %v2886_v31 = vld [vmem:[#allocation2 + $0x58] sm:$0xf] }
 0x328   : > { %4861 = vmatmul.mubr.bf16.gmra.mrb[8].mxu1 %v1268_v17  ;;  %v1274_v60 = vsel %vm1250_vm3, %v1272_v54, %v1273_v55  ;;  %v1522_v17 = vshll.u32 %v1494_v9, 16  ;;  %v2916_v50 = vshll.u32 %v2881_v41, 16  ;;  %v2915_v53 = vrot.slane %v2913_v46, 3  ;;  %v1499_v9 = vld [vmem:[#allocation2 + $0x30] sm:$0xf0] }
 0x329   : > { %4877 = vmatpush3.bf16.msra.mxu1 %v5342_v59  ;;  %4989 = vmatmul.mubr.bf16.gmra.mrb[8].mxu0 %v2625_v48  ;;  %v2647_v59 = vshll.u32 %v2522_v56, 16  ;;  %v2642_v4 = vsel %vm1509_vm5, %v2633_v57, %v2641_v26  ;;  %v1538_v48 = vrot.slane %v1536_v39, 4  ;;  %v1534_v52 = vor.u32 %v1533_v45, %v1530_v44  ;;  %v1497_v26 = vld [vmem:[#allocation2 + $0x20] sm:$0xf0]  ;;  %v5356_v44 = vld [vmem:[%s6063_s5 + $0xd8] sm:$0xff]  }
 0x32a   : > { %4878 = vmatprep.subr.bf16.mxu1 %v5344_v16  ;;  %5005 = vmatpush3.bf16.msra.mxu0 %v5343_v7  ;;  %v1524_v29 = vrot.slane %v1522_v17, 5  ;;  %v2921_v54 = vshrl.u32 %v2882_v42, 16  ;;  %v2918_v56 = vrot.slane %v2916_v50, 4  ;;  %v2924_v57 = vshll.u32 %v2882_v42, 16 }
 0x32b   : > { %5006 = vmatprep.subr.bf16.mxu0 %v5345_v25  ;;  %4864 = vmatprep.mubr.bf16.mxu1 %v1271_v49  ;;  %v2649_v1 = vrot.slane %v2647_v59, 5  ;;  %v1541_v49 = vrot.slane %v1539_v40, 5  ;;  %v5352_v59 = vld [vmem:[%s6063_s5 + $0xc8] sm:$0xff]   ;;  %v1548_v5 = vshll.u32 %v1497_v26, 16  ;;  %v1562_v27 = vshrl.u32 %v1499_v9, 16  ;;  %v5355_v40 = vld [vmem:[%s6063_s5 + $0x1d0] sm:$0xff]  }
 0x32c   : > { %4992 = vmatprep.mubr.bf16.mxu0 %v2642_v4  ;;  %v2923_v0 = vrot.slane %v2921_v54, 3  ;;  %v2919_v62 = vor.u32 %v2918_v56, %v2915_v53  ;;  %v5353_v4 = vld [vmem:[%s6063_s5 + $0x1c8] sm:$0xff]   ;;  %v2947_v39 = vshrl.u32 %v2885_v30, 16  ;;  %v5358_v53 = vld [vmem:[%s6063_s5 + $0xe0] sm:$0xff]  }
 0x32d   : > { %4879 = vmatpush3.bf16.msra.mxu1 %v5344_v16  ;;  %v2650_v7 = vor.u32 %v2649_v1, %v2646_v63  ;;  %v5798_v16 = vld [vmem:[%s6063_s5 + $0xc0] sm:$0xff]   ;;  %v1542_v55 = vor.u32 %v1541_v49, %v1538_v48  ;;  %v2926_v63 = vrot.slane %v2924_v57, 4  ;;  %v1545_v1 = vshrl.u32 %v1497_v26, 16  ;;  %v5357_v49 = vld [vmem:[%s6063_s5 + $0x1d8] sm:$0xff]   ;;  %v1502_v57 = vld [vmem:[#allocation2 + $0x48] sm:$0x1f] }
 0x32e   : > { %4880 = vmatprep.subr.bf16.mxu1 %v5346_v37  ;;  %5007 = vmatpush3.bf16.msra.mxu0 %v5345_v25  ;;  %v1521_v25 = vrot.slane %v1519_v14, 4  ;;  %v1500_v14 = vld [vmem:[#allocation2 + $0x38] sm:$0x1f]  ;;  %v1550_v17 = vrot.slane %v1548_v5, 5  ;;  %v2949_v46 = vrot.slane %v2947_v39, 3  ;;  %v2958_v48 = vshll.u32 %v2886_v31, 16 }
 0x32f   : > { %5008 = vmatprep.subr.bf16.mxu0 %v5347_v43  ;;  %v2659_v22 = vsel %vm1509_vm5, %v2650_v7, %v2658_v11  ;;  %v1543_v61 = vsel %vm1509_vm5, %v1534_v52, %v1542_v55  ;;  %v2927_v10 = vor.u32 %v2926_v63, %v2923_v0  ;;  %v1547_v11 = vrot.slane %v1545_v1, 4  ;;  %v1501_v56 = vld [vmem:[#allocation2 + $0x40] sm:$0xf0] }
 0x330   : > { %4865 = vmatmul.mubr.bf16.gmra.mrb[12].mxu1 %v1274_v60  ;;  %v1498_v60 = vld [vmem:[#allocation2 + $0x28] sm:$0x1f]  ;;  %v1573_v35 = vshll.u32 %v1500_v14, 16  ;;  %v2960_v55 = vrot.slane %v2958_v48, 4  ;;  %v1582_v26 = vshll.u32 %v1501_v56, 16  ;;  %v1587_v63 = vshrl.u32 %v1502_v57, 16 }
 0x331   : > { %4881 = vmatpush3.bf16.msra.mxu1 %v5346_v37  ;;  %4993 = vmatmul.mubr.bf16.gmra.mrb[12].mxu0 %v2659_v22  ;;  %v1525_v37 = vor.u32 %v1524_v29, %v1521_v25  ;;  %v1553_v6 = vshrl.u32 %v1498_v60, 16  ;;  %v1556_v7 = vshll.u32 %v1498_v60, 16  ;;  %v2928_v21 = vsel %vm896_vm4, %v2919_v62, %v2927_v10  ;;  %v2887_v60 = vld [vmem:[#allocation2 + $0x60] sm:$0xf8] }
 0x332   : > { %4882 = vmatprep.subr.bf16.mxu1 %v5348_v2  ;;  %5009 = vmatpush3.bf16.msra.mxu0 %v5347_v43  ;;  %v2909_v43 = vrot.slane %v2907_v34, 4  ;;  %v1565_v29 = vshll.u32 %v1499_v9, 16  ;;  %v1570_v34 = vshrl.u32 %v1500_v14, 16  ;;  %v1590_v1 = vshll.u32 %v1502_v57, 16  ;;  %v1504_v9 = vld [vmem:[#allocation2 + $0x58] sm:$0x1f] }
 0x333   : > { %5010 = vmatprep.subr.bf16.mxu0 %v5349_v3  ;;  %v1526_v47 = vsel %vm1509_vm5, %v1517_v33, %v1525_v37  ;;  %v1555_v18 = vrot.slane %v1553_v6, 4  ;;  %v1558_v19 = vrot.slane %v1556_v7, 5  ;;  %v1564_v37 = vrot.slane %v1562_v27, 4  ;;  %v5360_v14 = vld [vmem:[%s6063_s5 + $0xe8] sm:$0xff]  }
 0x334   : > { %4884 = vmatprep.mubr.bf16.mxu1 %v1526_v47  ;;  %v2910_v51 = vor.u32 %v2909_v43, %v2906_v32  ;;  %v1572_v42 = vrot.slane %v1570_v34, 4  ;;  %v2950_v43 = vshll.u32 %v2885_v30, 16  ;;  %v2955_v47 = vshrl.u32 %v2886_v31, 16  ;;  %v2892_v57 = vld [vmem:[#allocation2 + $0x88] sm:$0xf] }
 0x335   : > { %4883 = vmatpush3.bf16.msra.mxu1 %v5348_v2  ;;  %v2883_v2 = vld [vmem:[#allocation2 + $0x40] sm:$0xf8]  ;;  %v1559_v25 = vor.u32 %v1558_v19, %v1555_v18  ;;  %v1584_v6 = vrot.slane %v1582_v26, 5  ;;  %v2967_v7 = vshll.u32 %v2887_v60, 16  ;;  %v1607_v27 = vshll.u32 %v1504_v9, 16 }
 0x336   : > { %4900 = vmatprep.subr.bf16.mxu1 %v5798_v16  ;;  %5011 = vmatpush3.bf16.msra.mxu0 %v5349_v3  ;;  %v2911_v58 = vsel %vm896_vm4, %v2902_v38, %v2910_v51  ;;  %v2884_v3 = vld [vmem:[#allocation2 + $0x48] sm:$0xf]  ;;  %v2930_v8 = vshrl.u32 %v2883_v2, 16  ;;  %v2933_v12 = vshll.u32 %v2883_v2, 16  ;;  %v1567_v38 = vrot.slane %v1565_v29, 5 }
 0x337   : > { %5028 = vmatprep.subr.bf16.mxu0 %v5804_v28  ;;  %5012 = vmatprep.mubr.bf16.mxu0 %v2911_v58  ;;  %v2938_v13 = vshrl.u32 %v2884_v3, 16  ;;  %v2941_v24 = vshll.u32 %v2884_v3, 16  ;;  %v2952_v52 = vrot.slane %v2950_v43, 4  ;;  %v2957_v54 = vrot.slane %v2955_v47, 3  ;;  %v1503_v3 = vld [vmem:[#allocation2 + $0x50] sm:$0xf0] }
 0x338   : > { %4885 = vmatmul.mubr.bf16.vlgmr.msra.gmra.mrb[0].mxu1 %v1543_v61  ;;  %v2932_v20 = vrot.slane %v2930_v8, 3  ;;  %v2935_v22 = vrot.slane %v2933_v12, 4  ;;  %v1568_v45 = vor.u32 %v1567_v38, %v1564_v37  ;;  %v2888_v61 = vld [vmem:[#allocation2 + $0x68] sm:$0xf]  ;;  %v2964_v2 = vshrl.u32 %v2887_v60, 16  ;;  %v5363_v43 = vld [vmem:[%s6063_s5 + $0x1f0] sm:$0xff]  }
 0x339   : > { %4901 = vmatpush3.bf16.msra.mxu1 %v5798_v16  ;;  %v2940_v23 = vrot.slane %v2938_v13, 3  ;;  %5013 = vmatmul.mubr.bf16.vlgmr.msra.gmra.mrb[0].mxu0 %v2928_v21  ;;  %v1551_v16 = vor.u32 %v1550_v17, %v1547_v11  ;;  %v2943_v33 = vrot.slane %v2941_v24, 4  ;;  %v2953_v0 = vor.u32 %v2952_v52, %v2949_v46  ;;  %v2889_v24 = vld [vmem:[#allocation2 + $0x70] sm:$0xf8]  ;;  %v2890_v29 = vld [vmem:[#allocation2 + $0x78] sm:$0xf] }
 0x33a   : > { %4902 = vmatprep.subr.bf16.mxu1 %v5352_v59  ;;  %5029 = vmatpush3.bf16.msra.mxu0 %v5804_v28  ;;  %v2936_v32 = vor.u32 %v2935_v22, %v2932_v20  ;;  %v1575_v28 = vrot.slane %v1573_v35, 5  ;;  %v2961_v62 = vor.u32 %v2960_v55, %v2957_v54  ;;  %v2972_v8 = vshrl.u32 %v2888_v61, 16  ;;  %v5361_v35 = vld [vmem:[%s6063_s5 + $0x1e8] sm:$0xff]   ;;  %v5364_v47 = vld [vmem:[%s6063_s5 + $0xf8] sm:$0xff]   ;;  %v1507_v60 = vld [vmem:[#allocation2 + $0x70] sm:$0xf0] }
 0x33b   : > { %5030 = vmatprep.subr.bf16.mxu0 %v5353_v4  ;;  %v1560_v36 = vsel %vm1509_vm5, %v1551_v16, %v1559_v25  ;;  %v2944_v41 = vor.u32 %v2943_v33, %v2940_v23  ;;  %v1589_v11 = vrot.slane %v1587_v63, 4  ;;  %v1592_v12 = vrot.slane %v1590_v1, 5 }
 0x33c   : > { %4888 = vmatprep.mubr.bf16.mxu1 %v1560_v36  ;;  %v1576_v51 = vor.u32 %v1575_v28, %v1572_v42  ;;  %v2962_v10 = vsel %vm896_vm4, %v2953_v0, %v2961_v62  ;;  %v2966_v13 = vrot.slane %v2964_v2, 3  ;;  %v2969_v17 = vrot.slane %v2967_v7, 4  ;;  %v1508_v2 = vld [vmem:[#allocation2 + $0x78] sm:$0x1f] }
 0x33d   : > { %4903 = vmatpush3.bf16.msra.mxu1 %v5352_v59  ;;  %v2945_v50 = vsel %vm896_vm4, %v2936_v32, %v2944_v41  ;;  %v1579_v59 = vshrl.u32 %v1501_v56, 16  ;;  %v2974_v18 = vrot.slane %v2972_v8, 3  ;;  %v2975_v19 = vshll.u32 %v2888_v61, 16  ;;  %v2891_v56 = vld [vmem:[#allocation2 + $0x80] sm:$0xf8]  ;;  %v5365_v7 = vld [vmem:[%s6063_s5 + $0x1f8] sm:$0xff]  }
 0x33e   : > { %4904 = vmatprep.subr.bf16.mxu1 %v5354_v15  ;;  %5031 = vmatpush3.bf16.msra.mxu0 %v5353_v4  ;;  %v1577_v58 = vsel %vm1509_vm5, %v1568_v45, %v1576_v51  ;;  %v5359_v4 = vld [vmem:[%s6063_s5 + $0x1e0] sm:$0xff]   ;;  %v1593_v20 = vor.u32 %v1592_v12, %v1589_v11  ;;  %v1596_v21 = vshrl.u32 %v1503_v3, 16  ;;  %v1599_v22 = vshll.u32 %v1503_v3, 16  ;;  %v1506_v51 = vld [vmem:[#allocation2 + $0x68] sm:$0x1f] }
 0x33f   : > { %5016 = vmatprep.mubr.bf16.mxu0 %v2945_v50  ;;  %5032 = vmatprep.subr.bf16.mxu0 %v5355_v40  ;;  %v1581_v5 = vrot.slane %v1579_v59, 4  ;;  %v1604_v23 = vshrl.u32 %v1504_v9, 16  ;;  %v2970_v16 = vor.u32 %v2969_v17, %v2966_v13  ;;  %v2977_v25 = vrot.slane %v2975_v19, 4  ;;  %v1505_v50 = vld [vmem:[#allocation2 + $0x60] sm:$0xf0] }
 0x340   : > { %4889 = vmatmul.mubr.bf16.gmra.mrb[4].mxu1 %v1577_v58  ;;  %v2981_v30 = vshrl.u32 %v2889_v24, 16  ;;  %v1598_v32 = vrot.slane %v1596_v21, 4  ;;  %v1601_v33 = vrot.slane %v1599_v22, 5  ;;  %v1609_v37 = vrot.slane %v1607_v27, 5  ;;  %v2893_v17 = vld [vmem:[#allocation2 + $0x90] sm:$0xf8] }
 0x341   : > { %4905 = vmatpush3.bf16.msra.mxu1 %v5354_v15  ;;  %5017 = vmatmul.mubr.bf16.gmra.mrb[4].mxu0 %v2962_v10  ;;  %v1585_v15 = vor.u32 %v1584_v6, %v1581_v5  ;;  %v1606_v34 = vrot.slane %v1604_v23, 4  ;;  %v2978_v36 = vor.u32 %v2977_v25, %v2974_v18  ;;  %v2984_v39 = vshll.u32 %v2889_v24, 16  ;;  %v2894_v21 = vld [vmem:[#allocation2 + $0x98] sm:$0xf]  ;;  %v5868_v27 = vld [vmem:[%s6063_s5 + $0x200] sm:$0xff]  }
 0x342   : > { %4906 = vmatprep.subr.bf16.mxu1 %v5356_v44  ;;  %5033 = vmatpush3.bf16.msra.mxu0 %v5355_v40  ;;  %v2983_v38 = vrot.slane %v2981_v30, 3  ;;  %v5362_v40 = vld [vmem:[%s6063_s5 + $0xf0] sm:$0xff]   ;;  %v1602_v41 = vor.u32 %v1601_v33, %v1598_v32  ;;  %v2989_v42 = vshrl.u32 %v2890_v29, 16  ;;  %v2992_v28 = vshll.u32 %v2890_v29, 16 }
 0x343   : > { %5034 = vmatprep.subr.bf16.mxu0 %v5357_v49  ;;  %v1594_v31 = vsel %vm1509_vm5, %v1585_v15, %v1593_v20  ;;  %v1610_v45 = vor.u32 %v1609_v37, %v1606_v34  ;;  %v2986_v46 = vrot.slane %v2984_v39, 4  ;;  %v1613_v54 = vshrl.u32 %v1505_v50, 16 }
 0x344   : > { %4892 = vmatprep.mubr.bf16.mxu1 %v1594_v31  ;;  %v2991_v48 = vrot.slane %v2989_v42, 3  ;;  %v1616_v55 = vshll.u32 %v1505_v50, 16  ;;  %v1621_v0 = vshrl.u32 %v1506_v51, 16  ;;  %v1624_v59 = vshll.u32 %v1506_v51, 16  ;;  %v1865_v42 = vld [vmem:[#allocation2 + $0x18] sm:$0xf] }
 0x345   : > { %4907 = vmatpush3.bf16.msra.mxu1 %v5356_v44  ;;  %v2979_v44 = vsel %vm896_vm4, %v2970_v16, %v2978_v36  ;;  %v1611_v52 = vsel %vm1509_vm5, %v1602_v41, %v1610_v45  ;;  %v2998_v26 = vshrl.u32 %v2891_v56, 16  ;;  %v1615_v61 = vrot.slane %v1613_v54, 4  ;;  %v1864_v41 = vld [vmem:[#allocation2 + $0x10] sm:$0xf8] }
 0x346   : > { %4908 = vmatprep.subr.bf16.mxu1 %v5358_v53  ;;  %5035 = vmatpush3.bf16.msra.mxu0 %v5357_v49  ;;  %v2994_v49 = vrot.slane %v2992_v28, 4  ;;  %v1618_v62 = vrot.slane %v1616_v55, 5  ;;  %v3001_v63 = vshll.u32 %v2891_v56, 16  ;;  %v3006_v1 = vshrl.u32 %v2892_v57, 16  ;;  %v1867_v56 = vld [vmem:[#allocation2 + $0x28] sm:$0xf] }
 0x347   : > { %5036 = vmatprep.subr.bf16.mxu0 %v5359_v4  ;;  %5020 = vmatprep.mubr.bf16.mxu0 %v2979_v44  ;;  %v1626_v5 = vrot.slane %v1624_v59, 5  ;;  %v3000_v6 = vrot.slane %v2998_v26, 3  ;;  %v3009_v11 = vshll.u32 %v2892_v57, 16  ;;  %v1630_v13 = vshrl.u32 %v1507_v60, 16 }
 0x348   : > { %4893 = vmatmul.mubr.bf16.gmra.mrb[8].mxu1 %v1611_v52  ;;  %v2995_v58 = vor.u32 %v2994_v49, %v2991_v48  ;;  %v1619_v8 = vor.u32 %v1618_v62, %v1615_v61  ;;  %v3003_v9 = vrot.slane %v3001_v63, 4  ;;  %v3008_v10 = vrot.slane %v3006_v1, 3  ;;  %v1866_v52 = vld [vmem:[#allocation2 + $0x20] sm:$0xf8] }
 0x349   : > { %4909 = vmatpush3.bf16.msra.mxu1 %v5358_v53  ;;  %v2987_v53 = vor.u32 %v2986_v46, %v2983_v38  ;;  %v1638_v15 = vshrl.u32 %v1508_v2, 16  ;;  %v3011_v19 = vrot.slane %v3009_v11, 4  ;;  %v1641_v20 = vshll.u32 %v1508_v2, 16  ;;  %v3249_v46 = vld [vmem:[#allocation2 + $0x20] sm:$0xf0] }
 0x34a   : > { %4910 = vmatprep.subr.bf16.mxu1 %v5360_v14  ;;  %5037 = vmatpush3.bf16.msra.mxu0 %v5359_v4  ;;  %v1623_v4 = vrot.slane %v1621_v0, 4  ;;  %v3004_v18 = vor.u32 %v3003_v9, %v3000_v6  ;;  %v3015_v22 = vshrl.u32 %v2893_v17, 16  ;;  %v1632_v24 = vrot.slane %v1630_v13, 4  ;;  %v3252_v2 = vld [vmem:[#allocation2 + $0x38] sm:$0xf] }
 0x34b   : > { %5038 = vmatprep.subr.bf16.mxu0 %v5361_v35  ;;  %v2996_v3 = vsel %vm896_vm4, %v2987_v53, %v2995_v58  ;;  %v1640_v25 = vrot.slane %v1638_v15, 4  ;;  %v3012_v29 = vor.u32 %v3011_v19, %v3008_v10  ;;  %v1643_v30 = vrot.slane %v1641_v20, 5  ;;  %v1869_v13 = vld [vmem:[#allocation2 + $0x38] sm:$0xf]  ;;  %v3253_v19 = vld [vmem:[#allocation2 + $0x40] sm:$0xf0] }
 0x34c   : > { %5021 = vmatmul.mubr.bf16.gmra.mrb[8].mxu0 %v2996_v3  ;;  %v1627_v12 = vor.u32 %v1626_v5, %v1623_v4  ;;  %v3017_v31 = vrot.slane %v3015_v22, 3  ;;  %v3018_v32 = vshll.u32 %v2893_v17, 16  ;;  %v3023_v34 = vshrl.u32 %v2894_v21, 16 }
 0x34d   : > { %4911 = vmatpush3.bf16.msra.mxu1 %v5360_v14  ;;  %v1633_v14 = vshll.u32 %v1507_v60, 16  ;;  %v3013_v36 = vsel %vm896_vm4, %v3004_v18, %v3012_v29  ;;  %v1644_v37 = vor.u32 %v1643_v30, %v1640_v25  ;;  %v1881_v44 = vshrl.u32 %v1864_v41, 16  ;;  %v3251_v60 = vld [vmem:[#allocation2 + $0x30] sm:$0xf0] }
 0x34e   : > { %4912 = vmatprep.subr.bf16.mxu1 %v5362_v40  ;;  %5039 = vmatpush3.bf16.msra.mxu0 %v5361_v35  ;;  %v1628_v23 = vsel %vm1509_vm5, %v1619_v8, %v1627_v12  ;;  %v3026_v35 = vshll.u32 %v2894_v21, 16  ;;  %v3020_v38 = vrot.slane %v3018_v32, 4  ;;  %v3025_v39 = vrot.slane %v3023_v34, 3  ;;  %v1868_v12 = vld [vmem:[#allocation2 + $0x30] sm:$0xf8] }
 0x34f   : > { %5040 = vmatprep.subr.bf16.mxu0 %v5363_v43  ;;  %v1635_v16 = vrot.slane %v1633_v14, 5  ;;  %4896 = vmatprep.mubr.bf16.mxu1 %v1628_v23  ;;  %v1884_v45 = vshll.u32 %v1864_v41, 16  ;;  %v1889_v49 = vshrl.u32 %v1865_v42, 16  ;;  %v1892_v50 = vshll.u32 %v1865_v42, 16  ;;  %v5367_v14 = vld [vmem:[%s6063_s5 + $0x208] sm:$0xff]  }
 0x350   : > { %5024 = vmatprep.mubr.bf16.mxu0 %v3013_v36  ;;  %v3281_v51 = vrot.slane %v3249_v46, 4  ;;  %v1883_v53 = vrot.slane %v1881_v44, 3  ;;  %v1898_v57 = vshrl.u32 %v1866_v52, 16  ;;  %v1901_v26 = vshll.u32 %v1866_v52, 16  ;;  %v3254_v23 = vld [vmem:[#allocation2 + $0x48] sm:$0xf] }
 0x351   : > { %4913 = vmatpush3.bf16.msra.mxu1 %v5362_v40  ;;  %v1636_v33 = vor.u32 %v1635_v16, %v1632_v24  ;;  %v3028_v40 = vrot.slane %v3026_v35, 4  ;;  %v1886_v54 = vrot.slane %v1884_v45, 4  ;;  %v1891_v0 = vrot.slane %v1889_v49, 3  ;;  %v1870_v16 = vld [vmem:[#allocation2 + $0x40] sm:$0xf8]  ;;  %v5368_v49 = vld [vmem:[%s6063_s5 + $0x210] sm:$0xff]  }
 0x352   : > { %4914 = vmatprep.subr.bf16.mxu1 %v5364_v47  ;;  %5041 = vmatpush3.bf16.msra.mxu0 %v5363_v43  ;;  %v3021_v43 = vor.u32 %v3020_v38, %v3017_v31  ;;  %v1894_v59 = vrot.slane %v1892_v50, 4  ;;  %v1900_v63 = vrot.slane %v1898_v57, 3  ;;  %v1906_v1 = vshrl.u32 %v1867_v56, 16  ;;  %v1871_v32 = vld [vmem:[#allocation2 + $0x48] sm:$0xf] }
 0x353   : > { %5042 = vmatprep.subr.bf16.mxu0 %v5365_v7  ;;  %v1645_v28 = vsel %vm1509_vm5, %v1636_v33, %v1644_v37  ;;  %v3029_v48 = vor.u32 %v3028_v40, %v3025_v39  ;;  %v1887_v61 = vor.u32 %v1886_v54, %v1883_v53  ;;  %v1903_v4 = vrot.slane %v1901_v26, 4  ;;  %v3255_v37 = vld [vmem:[#allocation2 + $0x50] sm:$0xf0]  ;;  %v3256_v42 = vld [vmem:[#allocation2 + $0x58] sm:$0xf] }
 0x354   : > { %4897 = vmatmul.mubr.bf16.gmra.mrb[12].mxu1 %v1645_v28  ;;  %v1895_v3 = vor.u32 %v1894_v59, %v1891_v0  ;;  %v1909_v5 = vshll.u32 %v1867_v56, 16  ;;  %v3284_v6 = vrot.slane %v3251_v60, 4  ;;  %v3285_v8 = vrot.slane %v3252_v2, 4  ;;  %v1872_v52 = vld [vmem:[#allocation2 + $0x50] sm:$0xf8] }
 0x355   : > { %4915 = vmatpush3.bf16.msra.mxu1 %v5364_v47  ;;  %v3250_v47 = vld [vmem:[#allocation2 + $0x28] sm:$0xf]  ;;  %v3030_v58 = vsel %vm896_vm4, %v3021_v43, %v3029_v48  ;;  %v1904_v10 = vor.u32 %v1903_v4, %v1900_v63  ;;  %v1915_v15 = vshrl.u32 %v1868_v12, 16  ;;  %v1918_v17 = vshll.u32 %v1868_v12, 16  ;;  %v1873_v53 = vld [vmem:[#allocation2 + $0x58] sm:$0xf] }
 0x356   : > { %5043 = vmatpush3.bf16.msra.mxu0 %v5365_v7  ;;  %v3282_v55 = vrot.slane %v3250_v47, 4  ;;  %v1908_v7 = vrot.slane %v1906_v1, 3  ;;  %v1896_v9 = vsel %vm896_vm4, %v1887_v61, %v1895_v3  ;;  %v1911_v11 = vrot.slane %v1909_v5, 4  ;;  %v3257_v57 = vld [vmem:[#allocation2 + $0x60] sm:$0xf0]  ;;  %v5369_v63 = vld [vmem:[%s6063_s5 + $0x218] sm:$0xff]  }
 0x357   : > { %5060 = vmatprep.subr.bf16.mxu0 %v5868_v27  ;;  %5025 = vmatmul.mubr.bf16.gmra.mrb[12].mxu0 %v3030_v58  ;;  %v1923_v18 = vshrl.u32 %v1869_v13, 16  ;;  %v3286_v21 = vsel %vm1250_vm3, %v3284_v6, %v3285_v8  ;;  %v1926_v22 = vshll.u32 %v1869_v13, 16  ;;  %v3287_v24 = vrot.slane %v3253_v19, 4  ;;  %v3258_v58 = vld [vmem:[#allocation2 + $0x68] sm:$0xf] }
 0x358   : > { %v3283_v62 = vsel %vm1250_vm3, %v3281_v51, %v3282_v55  ;;  %4916 = vmatprep.mubr.bf16.mxu1 %v1896_v9  ;;  %v1912_v20 = vor.u32 %v1911_v11, %v1908_v7  ;;  %v1917_v25 = vrot.slane %v1915_v15, 3  ;;  %v1920_v29 = vrot.slane %v1918_v17, 4  ;;  %v1874_v61 = vld [vmem:[#allocation2 + $0x60] sm:$0xf8]  ;;  %v1875_v3 = vld [vmem:[#allocation2 + $0x68] sm:$0xf] }
 0x359   : > { %5044 = vmatprep.mubr.bf16.mxu0 %v3283_v62  ;;  %v1925_v30 = vrot.slane %v1923_v18, 3  ;;  %v3288_v31 = vrot.slane %v3254_v23, 4  ;;  %v1928_v34 = vrot.slane %v1926_v22, 4  ;;  %v1932_v35 = vshrl.u32 %v1870_v16, 16  ;;  %v3259_v9 = vld [vmem:[#allocation2 + $0x70] sm:$0xf0] }
 0x35a   : > { %v1913_v33 = vsel %vm896_vm4, %v1904_v10, %v1912_v20  ;;  %v1935_v36 = vshll.u32 %v1870_v16, 16  ;;  %v1921_v38 = vor.u32 %v1920_v29, %v1917_v25  ;;  %v1940_v40 = vshrl.u32 %v1871_v32, 16  ;;  %v5370_v20 = vld [vmem:[%s6063_s5 + $0x220] sm:$0xff]   ;;  %v1876_v16 = vld [vmem:[#allocation2 + $0x70] sm:$0xf8] }
 0x35b   : > { %v3289_v39 = vsel %vm1250_vm3, %v3287_v24, %v3288_v31  ;;  %v1943_v41 = vshll.u32 %v1871_v32, 16  ;;  %v1929_v28 = vor.u32 %v1928_v34, %v1925_v30  ;;  %v1934_v43 = vrot.slane %v1932_v35, 3  ;;  %v1877_v25 = vld [vmem:[#allocation2 + $0x78] sm:$0xf] }
 0x35c   : > { %4917 = vmatmul.mubr.bf16.vlgmr.msra.gmra.mrb[0].mxu1 %v1913_v33  ;;  %v1937_v44 = vrot.slane %v1935_v36, 4  ;;  %v3290_v45 = vrot.slane %v3255_v37, 4  ;;  %v1942_v46 = vrot.slane %v1940_v40, 3  ;;  %v3291_v48 = vrot.slane %v3256_v42, 4  ;;  %v3261_v33 = vld [vmem:[#allocation2 + $0x80] sm:$0xf0] }
 0x35d   : > { %v1945_v47 = vrot.slane %v1943_v41, 4  ;;  %v1930_v50 = vsel %vm896_vm4, %v1921_v38, %v1929_v28  ;;  %v1949_v55 = vshrl.u32 %v1872_v52, 16  ;;  %v1952_v56 = vshll.u32 %v1872_v52, 16  ;;  %v3262_v36 = vld [vmem:[#allocation2 + $0x88] sm:$0xf] }
 0x35e   : > { %v1938_v51 = vor.u32 %v1937_v44, %v1934_v43  ;;  %4920 = vmatprep.mubr.bf16.mxu1 %v1930_v50  ;;  %v3292_v54 = vsel %vm1250_vm3, %v3290_v45, %v3291_v48  ;;  %v1957_v0 = vshrl.u32 %v1873_v53, 16  ;;  %v1960_v59 = vshll.u32 %v1873_v53, 16  ;;  %v1878_v38 = vld [vmem:[#allocation2 + $0x80] sm:$0xf8]  ;;  %v5371_v40 = vld [vmem:[%s6063_s5 + $0x228] sm:$0xff]  }
 0x35f   : > { %5045 = vmatmul.mubr.bf16.vlgmr.msra.gmra.mrb[0].mxu0 %v3286_v21  ;;  %v3293_v26 = vrot.slane %v3257_v57, 4  ;;  %v3294_v60 = vrot.slane %v3258_v58, 4  ;;  %v1951_v1 = vrot.slane %v1949_v55, 3  ;;  %v1954_v2 = vrot.slane %v1952_v56, 4  ;;  %v1879_v43 = vld [vmem:[#allocation2 + $0x88] sm:$0xf] }
 0x360   : > { %5061 = vmatpush3.bf16.msra.mxu0 %v5868_v27  ;;  %5048 = vmatprep.mubr.bf16.mxu0 %v3289_v39  ;;  %v1946_v27 = vor.u32 %v1945_v47, %v1942_v46  ;;  %v1966_v4 = vshrl.u32 %v1874_v61, 16  ;;  %v1959_v5 = vrot.slane %v1957_v0, 3  ;;  %v1962_v6 = vrot.slane %v1960_v59, 4  ;;  %v3263_v48 = vld [vmem:[#allocation2 + $0x90] sm:$0xf0] }
 0x361   : > { %5062 = vmatprep.subr.bf16.mxu0 %v5367_v14  ;;  %v3295_v7 = vsel %vm1250_vm3, %v3293_v26, %v3294_v60  ;;  %v1969_v8 = vshll.u32 %v1874_v61, 16  ;;  %v1955_v10 = vor.u32 %v1954_v2, %v1951_v1  ;;  %v1974_v12 = vshrl.u32 %v1875_v3, 16  ;;  %v3264_v52 = vld [vmem:[#allocation2 + $0x98] sm:$0xf]  ;;  %v5372_v59 = vld [vmem:[%s6063_s5 + $0x230] sm:$0xff]  }
 0x362   : > { %v1947_v62 = vsel %vm896_vm4, %v1938_v51, %v1946_v27  ;;  %v1968_v11 = vrot.slane %v1966_v4, 3  ;;  %v1977_v13 = vshll.u32 %v1875_v3, 16  ;;  %v1963_v15 = vor.u32 %v1962_v6, %v1959_v5  ;;  %v3523_v61 = vld [vmem:[#allocation2 + $0x20] sm:$0xf0]  ;;  %v3525_v4 = vld [vmem:[#allocation2 + $0x30] sm:$0xf0] }
 0x363   : > { %v1971_v17 = vrot.slane %v1969_v8, 4  ;;  %v3296_v18 = vrot.slane %v3259_v9, 4  ;;  %v1976_v21 = vrot.slane %v1974_v12, 3  ;;  %v1983_v30 = vshrl.u32 %v1876_v16, 16  ;;  %v3526_v5 = vld [vmem:[#allocation2 + $0x38] sm:$0x1f] }
 0x364   : > { %5063 = vmatpush3.bf16.msra.mxu0 %v5367_v14  ;;  %4921 = vmatmul.mubr.bf16.gmra.mrb[4].mxu1 %v1947_v62  ;;  %v3260_v14 = vld [vmem:[#allocation2 + $0x78] sm:$0xf]  ;;  %v1979_v22 = vrot.slane %v1977_v13, 4  ;;  %v1964_v23 = vsel %vm896_vm4, %v1955_v10, %v1963_v15  ;;  %v1986_v31 = vshll.u32 %v1876_v16, 16  ;;  %v1991_v32 = vshrl.u32 %v1877_v25, 16 }
 0x365   : > { %5064 = vmatprep.subr.bf16.mxu0 %v5368_v49  ;;  %v3297_v19 = vrot.slane %v3260_v14, 4  ;;  %v1972_v24 = vor.u32 %v1971_v17, %v1968_v11  ;;  %4924 = vmatprep.mubr.bf16.mxu1 %v1964_v23  ;;  %v1994_v35 = vshll.u32 %v1877_v25, 16  ;;  %v3299_v37 = vrot.slane %v3261_v33, 4  ;;  %v3524_v62 = vld [vmem:[#allocation2 + $0x28] sm:$0x1f]  ;;  %v5373_v12 = vld [vmem:[%s6063_s5 + $0x238] sm:$0xff]  }
 0x366   : > { %v1980_v29 = vor.u32 %v1979_v22, %v1976_v21  ;;  %v1985_v41 = vrot.slane %v1983_v30, 3  ;;  %v1988_v42 = vrot.slane %v1986_v31, 4  ;;  %v1993_v28 = vrot.slane %v1991_v32, 3  ;;  %v3527_v10 = vld [vmem:[#allocation2 + $0x40] sm:$0xf0] }
 0x367   : > { %5049 = vmatmul.mubr.bf16.gmra.mrb[4].mxu0 %v3292_v54  ;;  %v3298_v34 = vsel %vm1250_vm3, %v3296_v18, %v3297_v19  ;;  %v1996_v44 = vrot.slane %v1994_v35, 4  ;;  %v3300_v45 = vrot.slane %v3262_v36, 4  ;;  %v2000_v46 = vshrl.u32 %v1878_v38, 16  ;;  %v3528_v17 = vld [vmem:[#allocation2 + $0x48] sm:$0x1f] }
 0x368   : > { %5065 = vmatpush3.bf16.msra.mxu0 %v5368_v49  ;;  %5052 = vmatprep.mubr.bf16.mxu0 %v3295_v7  ;;  %v1981_v39 = vsel %vm896_vm4, %v1972_v24, %v1980_v29  ;;  %v2003_v47 = vshll.u32 %v1878_v38, 16  ;;  %v1989_v49 = vor.u32 %v1988_v42, %v1985_v41  ;;  %v2008_v50 = vshrl.u32 %v1879_v43, 16  ;;  %v3529_v22 = vld [vmem:[#allocation2 + $0x50] sm:$0xf0]  ;;  %v3530_v33 = vld [vmem:[#allocation2 + $0x58] sm:$0x1f] }
 0x369   : > { %5066 = vmatprep.subr.bf16.mxu0 %v5369_v63  ;;  %v2011_v51 = vshll.u32 %v1879_v43, 16  ;;  %v3302_v53 = vrot.slane %v3263_v48, 4  ;;  %v1997_v27 = vor.u32 %v1996_v44, %v1993_v28  ;;  %v3301_v54 = vsel %vm1250_vm3, %v3299_v37, %v3300_v45  ;;  %v3531_v38 = vld [vmem:[#allocation2 + $0x60] sm:$0xf0] }
 0x36a   : > { %v2002_v55 = vrot.slane %v2000_v46, 3  ;;  %v2005_v56 = vrot.slane %v2003_v47, 4  ;;  %v2010_v57 = vrot.slane %v2008_v50, 3  ;;  %v3303_v0 = vrot.slane %v3264_v52, 4  ;;  %v3532_v46 = vld [vmem:[#allocation2 + $0x68] sm:$0x1f] }
 0x36b   : > { %v2013_v58 = vrot.slane %v2011_v51, 4  ;;  %v1998_v26 = vsel %vm896_vm4, %v1989_v49, %v1997_v27  ;;  %v3540_v2 = vshrl.u32 %v3523_v61, 16  ;;  %v3543_v3 = vshll.u32 %v3523_v61, 16  ;;  %v3533_v51 = vld [vmem:[#allocation2 + $0x70] sm:$0xf0] }
 0x36c   : > { %5067 = vmatpush3.bf16.msra.mxu0 %v5369_v63  ;;  %4925 = vmatmul.mubr.bf16.gmra.mrb[8].mxu1 %v1981_v39  ;;  %v2006_v60 = vor.u32 %v2005_v56, %v2002_v55  ;;  %v3304_v1 = vsel %vm1250_vm3, %v3302_v53, %v3303_v0  ;;  %v3548_v6 = vshrl.u32 %v3524_v62, 16  ;;  %v3551_v7 = vshll.u32 %v3524_v62, 16  ;;  %v3534_v55 = vld [vmem:[#allocation2 + $0x78] sm:$0x1f]  ;;  %v3535_v56 = vld [vmem:[#allocation2 + $0x80] sm:$0xf0] }
 0x36d   : > { %5068 = vmatprep.subr.bf16.mxu0 %v5370_v20  ;;  %4928 = vmatprep.mubr.bf16.mxu1 %v1998_v26  ;;  %v2014_v63 = vor.u32 %v2013_v58, %v2010_v57  ;;  %v3557_v8 = vshrl.u32 %v3525_v4, 16  ;;  %v3560_v9 = vshll.u32 %v3525_v4, 16  ;;  %v3542_v13 = vrot.slane %v3540_v2, 4  ;;  %v3536_v26 = vld [vmem:[#allocation2 + $0x88] sm:$0x1f] }
 0x36e   : > { %v3545_v14 = vrot.slane %v3543_v3, 5  ;;  %v3565_v15 = vshrl.u32 %v3526_v5, 16  ;;  %v3550_v18 = vrot.slane %v3548_v6, 4  ;;  %v3553_v19 = vrot.slane %v3551_v7, 5 }
 0x36f   : > { %5053 = vmatmul.mubr.bf16.gmra.mrb[8].mxu0 %v3298_v34  ;;  %v2015_v11 = vsel %vm896_vm4, %v2006_v60, %v2014_v63  ;;  %v3562_v21 = vrot.slane %v3560_v9, 5  ;;  %v3568_v16 = vshll.u32 %v3526_v5, 16  ;;  %v3574_v25 = vshrl.u32 %v3527_v10, 16 }
 0x370   : > { %5069 = vmatpush3.bf16.msra.mxu0 %v5370_v20  ;;  %5056 = vmatprep.mubr.bf16.mxu0 %v3301_v54  ;;  %v3559_v20 = vrot.slane %v3557_v8, 4  ;;  %v3546_v23 = vor.u32 %v3545_v14, %v3542_v13  ;;  %v3567_v24 = vrot.slane %v3565_v15, 4  ;;  %v3554_v29 = vor.u32 %v3553_v19, %v3550_v18 }
 0x371   : > { %5070 = vmatprep.subr.bf16.mxu0 %v5371_v40  ;;  %v3577_v31 = vshll.u32 %v3527_v10, 16  ;;  %v3582_v32 = vshrl.u32 %v3528_v17, 16  ;;  %v3570_v34 = vrot.slane %v3568_v16, 5  ;;  %v3576_v35 = vrot.slane %v3574_v25, 4 }
 0x372   : > { %v3563_v30 = vor.u32 %v3562_v21, %v3559_v20  ;;  %v3585_v36 = vshll.u32 %v3528_v17, 16  ;;  %v3591_v37 = vshrl.u32 %v3529_v22, 16  ;;  %v3555_v39 = vsel %vm1509_vm5, %v3546_v23, %v3554_v29  ;;  %v3538_v17 = vld [vmem:[#allocation2 + $0x98] sm:$0x1f] }
 0x373   : > { %v3584_v41 = vrot.slane %v3582_v32, 4  ;;  %v3594_v42 = vshll.u32 %v3529_v22, 16  ;;  %v3571_v28 = vor.u32 %v3570_v34, %v3567_v24  ;;  %v3599_v45 = vshrl.u32 %v3530_v33, 16 }
 0x374   : > { %5071 = vmatpush3.bf16.msra.mxu0 %v5371_v40  ;;  %4929 = vmatmul.mubr.bf16.gmra.mrb[12].mxu1 %v2015_v11  ;;  %v3579_v40 = vrot.slane %v3577_v31, 5  ;;  %v3587_v43 = vrot.slane %v3585_v36, 5  ;;  %v3593_v44 = vrot.slane %v3591_v37, 4  ;;  %v3602_v49 = vshll.u32 %v3530_v33, 16  ;;  %v3537_v11 = vld [vmem:[#allocation2 + $0x90] sm:$0xf0] }
 0x375   : > { %5072 = vmatprep.subr.bf16.mxu0 %v5372_v59  ;;  %v3596_v48 = vrot.slane %v3594_v42, 5  ;;  %v3608_v50 = vshrl.u32 %v3531_v38, 16  ;;  %v3572_v52 = vsel %vm1509_vm5, %v3563_v30, %v3571_v28  ;;  %v3601_v27 = vrot.slane %v3599_v45, 4  ;;  %v5375_v45 = vld [vmem:[%s6065_s7 + $0x8] sm:$0xff]  }
 0x376   : > { %v3580_v47 = vor.u32 %v3579_v40, %v3576_v35  ;;  %v3588_v53 = vor.u32 %v3587_v43, %v3584_v41  ;;  %v3611_v54 = vshll.u32 %v3531_v38, 16  ;;  %v3604_v58 = vrot.slane %v3602_v49, 5  ;;  %v5379_v49 = vld [vmem:[%s6065_s7 + $0x28] sm:$0xff]  }
 0x377   : > { %5057 = vmatmul.mubr.bf16.gmra.mrb[12].mxu0 %v3304_v1  ;;  %v3597_v57 = vor.u32 %v3596_v48, %v3593_v44  ;;  %v3610_v0 = vrot.slane %v3608_v50, 4  ;;  %v3619_v62 = vshll.u32 %v3532_v46, 16  ;;  %v3625_v63 = vshrl.u32 %v3533_v51, 16  ;;  %v5374_v44 = vld [vmem:[%s6065_s7] sm:$0xff]   ;;  %v5380_v50 = vld [vmem:[%s6065_s7 + $0x30] sm:$0xff]  }
 0x378   : > { %5073 = vmatpush3.bf16.msra.mxu0 %v5372_v59  ;;  %5076 = vmatprep.mubr.bf16.mxu0 %v3555_v39  ;;  %v3616_v59 = vshrl.u32 %v3532_v46, 16  ;;  %v3589_v60 = vsel %vm1509_vm5, %v3580_v47, %v3588_v53  ;;  %v3613_v61 = vrot.slane %v3611_v54, 5  ;;  %v3605_v1 = vor.u32 %v3604_v58, %v3601_v27  ;;  %v5376_v46 = vld [vmem:[%s6065_s7 + $0x10] sm:$0xff]   ;;  %v5377_v47 = vld [vmem:[%s6065_s7 + $0x18] sm:$0xff]   ;;  %v5378_v48 = vld [vmem:[%s6065_s7 + $0x20] sm:$0xff]  }
 0x379   : > { %5074 = vmatprep.subr.bf16.mxu0 %v5373_v12  ;;  %v3628_v3 = vshll.u32 %v3533_v51, 16  ;;  %v3633_v4 = vshrl.u32 %v3534_v55, 16  ;;  %v3621_v6 = vrot.slane %v3619_v62, 5  ;;  %v3636_v7 = vshll.u32 %v3534_v55, 16  ;;  %5092 = vmatprep.subr.bf16.mxu1 %v5374_v44  ;;  %v5381_v51 = vld [vmem:[%s6065_s7 + $0x38] sm:$0xff]  }
 0x37a   : > { %v3618_v2 = vrot.slane %v3616_v59, 4  ;;  %v3614_v5 = vor.u32 %v3613_v61, %v3610_v0  ;;  %v3606_v8 = vsel %vm1509_vm5, %v3597_v57, %v3605_v1  ;;  %v3627_v9 = vrot.slane %v3625_v63, 4  ;;  %5093 = vmatpush3.bf16.msra.mxu1 %v5374_v44 }
 0x37b   : > { %v3642_v10 = vshrl.u32 %v3535_v56, 16  ;;  %v3630_v13 = vrot.slane %v3628_v3, 5  ;;  %v3645_v14 = vshll.u32 %v3535_v56, 16  ;;  %v3650_v15 = vshrl.u32 %v3536_v26, 16  ;;  %5094 = vmatprep.subr.bf16.mxu1 %v5375_v45  ;;  %v5953_v3 = vld [vmem:[%s6064_s6] ss:$0 sm:$0xff] }
 0x37c   : > { %5075 = vmatpush3.bf16.msra.mxu0 %v5373_v12  ;;  %v3622_v12 = vor.u32 %v3621_v6, %v3618_v2  ;;  %v3635_v18 = vrot.slane %v3633_v4, 4  ;;  %v3638_v19 = vrot.slane %v3636_v7, 5  ;;  %v3653_v21 = vshll.u32 %v3536_v26, 16 }
 0x37d   : > { %v3644_v20 = vrot.slane %v3642_v10, 4  ;;  %v3647_v23 = vrot.slane %v3645_v14, 5  ;;  %v3652_v24 = vrot.slane %v3650_v15, 4  ;;  %v3659_v25 = vshrl.u32 %v3537_v11, 16 }
 0x37e   : > { %v3623_v22 = vsel %vm1509_vm5, %v3614_v5, %v3622_v12  ;;  %v3655_v16 = vrot.slane %v3653_v21, 5  ;;  %v3662_v29 = vshll.u32 %v3537_v11, 16  ;;  %v3631_v30 = vor.u32 %v3630_v13, %v3627_v9  ;;  %5095 = vmatpush3.bf16.msra.mxu1 %v5375_v45 }
 0x37f   : > { %5077 = vmatmul.mubr.bf16.vlgmr.msra.gmra.mrb[0].mxu0 %v3572_v52  ;;  %v3639_v31 = vor.u32 %v3638_v19, %v3635_v18  ;;  %v3667_v32 = vshrl.u32 %v3538_v17, 16  ;;  %v3670_v33 = vshll.u32 %v3538_v17, 16  ;;  %v3648_v34 = vor.u32 %v3647_v23, %v3644_v20  ;;  %5096 = vmatprep.subr.bf16.mxu1 %v5376_v46 }
 0x380   : > { %5080 = vmatprep.mubr.bf16.mxu0 %v3589_v60  ;;  %v3656_v35 = vor.u32 %v3655_v16, %v3652_v24  ;;  %v3661_v36 = vrot.slane %v3659_v25, 4  ;;  %v3664_v38 = vrot.slane %v3662_v29, 5 }
 0x381   : > { %v3640_v37 = vsel %vm1509_vm5, %v3631_v30, %v3639_v31  ;;  %v3669_v39 = vrot.slane %v3667_v32, 4  ;;  %v3672_v40 = vrot.slane %v3670_v33, 5 }
 0x382   : > { %v3657_v41 = vsel %vm1509_vm5, %v3648_v34, %v3656_v35  ;;  %v3665_v42 = vor.u32 %v3664_v38, %v3661_v36  ;;  %5097 = vmatpush3.bf16.msra.mxu1 %v5376_v46 }
 0x383   : > { %v3673_v28 = vor.u32 %v3672_v40, %v3669_v39  ;;  %5098 = vmatprep.subr.bf16.mxu1 %v5377_v47 }
 0x385   : > { %v3674_v43 = vsel %vm1509_vm5, %v3665_v42, %v3673_v28 }
 0x386   : > { %5099 = vmatpush3.bf16.msra.mxu1 %v5377_v47 }
 0x387   : > { %5081 = vmatmul.mubr.bf16.gmra.mrb[4].mxu0 %v3606_v8  ;;  %5100 = vmatprep.subr.bf16.mxu1 %v5378_v48 }
 0x388   : > { %5084 = vmatprep.mubr.bf16.mxu0 %v3623_v22 }
 0x38a   : > { %5101 = vmatpush3.bf16.msra.mxu1 %v5378_v48 }
 0x38b   : > { %5102 = vmatprep.subr.bf16.mxu1 %v5379_v49 }
 0x38e   : > { %5103 = vmatpush3.bf16.msra.mxu1 %v5379_v49 }
 0x38f   : > { %5085 = vmatmul.mubr.bf16.gmra.mrb[8].mxu0 %v3640_v37  ;;  %5104 = vmatprep.subr.bf16.mxu1 %v5380_v50 }
 0x390   : > { %5088 = vmatprep.mubr.bf16.mxu0 %v3657_v41 }
 0x392   : > { %5105 = vmatpush3.bf16.msra.mxu1 %v5380_v50 }
 0x393   : > { %5106 = vmatprep.subr.bf16.mxu1 %v5381_v51 }
 0x396   : > { %5107 = vmatpush3.bf16.msra.mxu1 %v5381_v51 }
 0x397   : > { %5089 = vmatmul.mubr.bf16.gmra.mrb[12].mxu0 %v3674_v43 }
 0x42f   : > { %v4918_v52 = vpop.f32.mrb[0].mxu1 }
 0x430   : > { %v2123_v53 = vpop.f32.mrb[1].mxu1 }
 0x431   : > { %v4919_v27 = vpop.f32.mrb[2].mxu1 }
 0x432   : > { %v2126_v54 = vpop.f32.mrb[3].mxu1 }
 0x437   : > { %v4922_v55 = vpop.f32.mrb[4].mxu1 }
 0x438   : > { %v2139_v56 = vpop.f32.mrb[5].mxu1 }
 0x439   : > { %v4923_v57 = vpop.f32.mrb[6].mxu1 }
 0x43a   : > { %v2142_v58 = vpop.f32.mrb[7].mxu1 }
 0x43f   : > { %v4926_v0 = vpop.f32.mrb[8].mxu1 }
 0x440   : > { %v2155_v59 = vpop.f32.mrb[9].mxu1 }
 0x441   : > { %v4927_v26 = vpop.f32.mrb[10].mxu1 }
 0x442   : > { %v2158_v60 = vpop.f32.mrb[11].mxu1 }
 0x447   : > { %v4930_v61 = vpop.f32.mrb[12].mxu1 }
 0x448   : > { %v5944_v62 = vpop.f32.mrb[13].mxu1 }
 0x449   : > { %v5946_v63 = vpop.f32.mrb[14].mxu1 }
 0x44a   : > { %v5948_v1 = vpop.f32.mrb[15].mxu1 }
 0x452   : > { %v5078_v2 = vpop.f32.mrb[0].mxu0 }
 0x453   : > { %v5126_v4 = vadd.f32 %v5078_v2, %v4918_v52  ;;  %v3782_v5 = vpop.f32.mrb[1].mxu0 }
 0x454   : > { %v5127_v6 = vadd.f32 %v3782_v5, %v2123_v53  ;;  %v5079_v7 = vpop.f32.mrb[2].mxu0 }
 0x455   : > { %v3918_v8 = vadd.f32 %v5126_v4, %v5953_v3  ;;  %v5128_v9 = vadd.f32 %v5079_v7, %v4919_v27  ;;  %v3785_v10 = vpop.f32.mrb[3].mxu0 }
 0x456   : > { %v3916_v11 = vadd.f32 %v5127_v6, %v5953_v3  ;;  %v5129_v12 = vadd.f32 %v3785_v10, %v2126_v54 }
 0x457   : > { %v3919_v13 = vadd.f32 %v5128_v9, %v5953_v3  ;;  %v3934_v15 = vmax.f32 %v3918_v8, 0.0 }
 0x458   : > { %v3917_v14 = vadd.f32 %v5129_v12, %v5953_v3  ;;  %v3932_v18 = vmax.f32 %v3916_v11, 0.0 }
 0x459   : > { %v3935_v17 = vmax.f32 %v3919_v13, 0.0 }
 0x45a   : > { %v3933_v19 = vmax.f32 %v3917_v14, 0.0  ;;  %v5082_v20 = vpop.f32.mrb[4].mxu0  ;;  %v4126_v14 = vld [vmem:[%s5535_s29 + $0x10] sm:$0xff] }
 0x45b   : > { %v3949_v21 = vpack.c.bf16 %v3935_v17, %v3934_v15  ;;  %v5130_v22 = vadd.f32 %v5082_v20, %v4922_v55  ;;  %v3798_v23 = vpop.f32.mrb[5].mxu0  ;;  %v4124_v17 = vld [vmem:[%s5535_s29] sm:$0xff]  ;;  %v4127_v20 = vld [vmem:[%s5535_s29 + $0x18] sm:$0xff] }
 0x45c   : > { %v5131_v24 = vadd.f32 %v3798_v23, %v2139_v56  ;;  %v5083_v16 = vpop.f32.mrb[6].mxu0  ;;  %v3948_v25 = vpack.c.bf16 %v3933_v19, %v3932_v18 }
 0x45d   : > { %v3922_v29 = vadd.f32 %v5130_v22, %v5953_v3  ;;  %v5132_v30 = vadd.f32 %v5083_v16, %v4923_v57  ;;  %v3801_v31 = vpop.f32.mrb[7].mxu0 }
 0x45e   : > { %v3920_v32 = vadd.f32 %v5131_v24, %v5953_v3  ;;  %v5133_v33 = vadd.f32 %v3801_v31, %v2142_v58  ;;  %5108 = vmatprep.mubr.bf16.mxu1 %v3948_v25  ;;  %v4125_v24 = vld [vmem:[%s5535_s29 + $0x8] sm:$0xff] }
 0x45f   : > { %v3923_v34 = vadd.f32 %v5132_v30, %v5953_v3  ;;  %5109 = vmatmul.mubr.bf16.vlgmr.msra.gmra.mrb[16].mxu1 %v3949_v21  ;;  %v3938_v36 = vmax.f32 %v3922_v29, 0.0 }
 0x460   : > { %v3921_v35 = vadd.f32 %v5133_v33, %v5953_v3  ;;  %v3936_v38 = vmax.f32 %v3920_v32, 0.0 }
 0x461   : > { %v3939_v37 = vmax.f32 %v3923_v34, 0.0 }
 0x462   : > { %v3937_v39 = vmax.f32 %v3921_v35, 0.0  ;;  %v5086_v40 = vpop.f32.mrb[8].mxu0 }
 0x463   : > { %v5134_v41 = vadd.f32 %v5086_v40, %v4926_v0  ;;  %v3814_v42 = vpop.f32.mrb[9].mxu0  ;;  %v3951_v28 = vpack.c.bf16 %v3939_v37, %v3938_v36  ;;  %v4130_v36 = vld [vmem:[%s5535_s29 + $0x30] sm:$0xff] }
 0x464   : > { %v5135_v43 = vadd.f32 %v3814_v42, %v2155_v59  ;;  %v5087_v44 = vpop.f32.mrb[10].mxu0  ;;  %v3950_v45 = vpack.c.bf16 %v3937_v39, %v3936_v38  ;;  %v4128_v39 = vld [vmem:[%s5535_s29 + $0x20] sm:$0xff]  ;;  %v4131_v42 = vld [vmem:[%s5535_s29 + $0x38] sm:$0xff] }
 0x465   : > { %v3926_v46 = vadd.f32 %v5134_v41, %v5953_v3  ;;  %v5136_v47 = vadd.f32 %v5087_v44, %v4927_v26  ;;  %v3817_v48 = vpop.f32.mrb[11].mxu0 }
 0x466   : > { %v3924_v49 = vadd.f32 %v5135_v43, %v5953_v3  ;;  %v5137_v50 = vadd.f32 %v3817_v48, %v2158_v60  ;;  %5112 = vmatprep.mubr.bf16.mxu1 %v3950_v45  ;;  %v4129_v45 = vld [vmem:[%s5535_s29 + $0x28] sm:$0xff] }
 0x467   : > { %v3927_v51 = vadd.f32 %v5136_v47, %v5953_v3  ;;  %5113 = vmatmul.mubr.bf16.gmra.mrb[20].mxu1 %v3951_v28  ;;  %v3942_v53 = vmax.f32 %v3926_v46, 0.0 }
 0x468   : > { %v3925_v52 = vadd.f32 %v5137_v50, %v5953_v3  ;;  %v3940_v54 = vmax.f32 %v3924_v49, 0.0 }
 0x469   : > { %v3943_v27 = vmax.f32 %v3927_v51, 0.0 }
 0x46a   : > { %v3941_v55 = vmax.f32 %v3925_v52, 0.0  ;;  %v5090_v56 = vpop.f32.mrb[12].mxu0 }
 0x46b   : > { %v5138_v57 = vadd.f32 %v5090_v56, %v4930_v61  ;;  %v3830_v58 = vpop.f32.mrb[13].mxu0  ;;  %v3953_v0 = vpack.c.bf16 %v3943_v27, %v3942_v53 }
 0x46c   : > { %v5139_v59 = vadd.f32 %v3830_v58, %v5944_v62  ;;  %v5091_v26 = vpop.f32.mrb[14].mxu0  ;;  %v3952_v2 = vpack.c.bf16 %v3941_v55, %v3940_v54  ;;  %v4134_v54 = vld [vmem:[%s5535_s29 + $0x50] sm:$0xff] }
 0x46d   : > { %v3930_v60 = vadd.f32 %v5138_v57, %v5953_v3  ;;  %v5140_v4 = vadd.f32 %v5091_v26, %v5946_v63  ;;  %v3833_v5 = vpop.f32.mrb[15].mxu0  ;;  %v4132_v57 = vld [vmem:[%s5535_s29 + $0x40] sm:$0xff] }
 0x46e   : > { %v3928_v6 = vadd.f32 %v5139_v59, %v5953_v3  ;;  %v5141_v7 = vadd.f32 %v3833_v5, %v5948_v1  ;;  %5116 = vmatprep.mubr.bf16.mxu1 %v3952_v2  ;;  %v5977_v1 = vld [vmem:[%s6066_s8] ss:$0 sm:$0xff]  ;;  %v4135_v59 = vld [vmem:[%s5535_s29 + $0x58] sm:$0xff] }
 0x46f   : > { %v3931_v8 = vadd.f32 %v5140_v4, %v5953_v3  ;;  %5117 = vmatmul.mubr.bf16.gmra.mrb[24].mxu1 %v3953_v0  ;;  %v3946_v62 = vmax.f32 %v3930_v60, 0.0  ;;  %v4133_v4 = vld [vmem:[%s5535_s29 + $0x48] sm:$0xff] }
 0x470   : > { %v3929_v61 = vadd.f32 %v5141_v7, %v5953_v3  ;;  %v3944_v10 = vmax.f32 %v3928_v6, 0.0 }
 0x471   : > { %v3947_v9 = vmax.f32 %v3931_v8, 0.0 }
 0x472   : > { %v3945_v11 = vmax.f32 %v3929_v61, 0.0 }
 0x473   : > { %v3955_v12 = vpack.c.bf16 %v3947_v9, %v3946_v62 }
 0x474   : > { %v3954_v63 = vpack.c.bf16 %v3945_v11, %v3944_v10 }
 0x476   : > { %5120 = vmatprep.mubr.bf16.mxu1 %v3954_v63 }
 0x477   : > { %5121 = vmatmul.mubr.bf16.gmra.mrb[28].mxu1 %v3955_v12  ;;  %v4138_v12 = vld [vmem:[%s5535_s29 + $0x70] sm:$0xff] }
 0x532   : > { %v5110_v13 = vpop.f32.mrb[16].mxu1 }
 0x533   : > { %v4070_v15 = vadd.f32 %v5110_v13, %v5977_v1  ;;  %v4061_v3 = vpop.f32.mrb[17].mxu1 }
 0x534   : > { %v4062_v18 = vadd.f32 %v5977_v1, %v4061_v3  ;;  %v5111_v19 = vpop.f32.mrb[18].mxu1 }
 0x535   : > { %v4142_v21 = vadd.f32 %v4126_v14, %v4070_v15  ;;  %v4073_v22 = vadd.f32 %v5111_v19, %v5977_v1  ;;  %v4064_v23 = vpop.f32.mrb[19].mxu1  ;;  %v4136_v14 = vld [vmem:[%s5535_s29 + $0x60] sm:$0xff] }
 0x536   : > { %v4140_v16 = vadd.f32 %v4124_v17, %v4062_v18  ;;  %v4065_v25 = vadd.f32 %v5977_v1, %v4064_v23  ;;  %v4139_v17 = vld [vmem:[%s5535_s29 + $0x78] sm:$0xff] }
 0x537   : > { %v4158_v29 = vmax.f32 %v4142_v21, 0.0  ;;  %v4143_v30 = vadd.f32 %v4127_v20, %v4073_v22  ;;  %v4137_v21 = vld [vmem:[%s5535_s29 + $0x68] sm:$0xff] }
 0x538   : > { %v4156_v31 = vmax.f32 %v4140_v16, 0.0  ;;  %v4141_v32 = vadd.f32 %v4125_v24, %v4065_v25 }
 0x539   : > { %4174 = vst.msk [vmem:[%s5540_s17 + $0x10] sm:$0xff] %vm561_vm0, %v4158_v29  ;;  %v4159_v33 = vmax.f32 %v4143_v30, 0.0 }
 0x53a   : > { %4172 = vst.msk [vmem:[%s5540_s17] sm:$0xff] %vm561_vm0, %v4156_v31  ;;  %v4157_v34 = vmax.f32 %v4141_v32, 0.0  ;;  %v5114_v35 = vpop.f32.mrb[20].mxu1 }
 0x53b   : > { %4175 = vst.msk [vmem:[%s5540_s17 + $0x18] sm:$0xff] %vm561_vm0, %v4159_v33  ;;  %v4086_v37 = vadd.f32 %v5114_v35, %v5977_v1  ;;  %v4077_v38 = vpop.f32.mrb[21].mxu1 }
 0x53c   : > { %4173 = vst.msk [vmem:[%s5540_s17 + $0x8] sm:$0xff] %vm561_vm0, %v4157_v34  ;;  %v4078_v40 = vadd.f32 %v5977_v1, %v4077_v38  ;;  %v5115_v41 = vpop.f32.mrb[22].mxu1 }
 0x53d   : > { %v4146_v28 = vadd.f32 %v4130_v36, %v4086_v37  ;;  %v4089_v43 = vadd.f32 %v5115_v41, %v5977_v1  ;;  %v4080_v44 = vpop.f32.mrb[23].mxu1 }
 0x53e   : > { %v4144_v46 = vadd.f32 %v4128_v39, %v4078_v40  ;;  %v4081_v47 = vadd.f32 %v5977_v1, %v4080_v44 }
 0x53f   : > { %v4162_v48 = vmax.f32 %v4146_v28, 0.0  ;;  %v4147_v49 = vadd.f32 %v4131_v42, %v4089_v43 }
 0x540   : > { %v4160_v50 = vmax.f32 %v4144_v46, 0.0  ;;  %v4145_v51 = vadd.f32 %v4129_v45, %v4081_v47 }
 0x541   : > { %4178 = vst.msk [vmem:[%s5540_s17 + $0x30] sm:$0xff] %vm561_vm0, %v4162_v48  ;;  %v4163_v52 = vmax.f32 %v4147_v49, 0.0 }
 0x542   : > { %4176 = vst.msk [vmem:[%s5540_s17 + $0x20] sm:$0xff] %vm561_vm0, %v4160_v50  ;;  %v4161_v53 = vmax.f32 %v4145_v51, 0.0  ;;  %v5118_v27 = vpop.f32.mrb[24].mxu1 }
 0x543   : > { %4179 = vst.msk [vmem:[%s5540_s17 + $0x38] sm:$0xff] %vm561_vm0, %v4163_v52  ;;  %v4102_v55 = vadd.f32 %v5118_v27, %v5977_v1  ;;  %v4093_v56 = vpop.f32.mrb[25].mxu1 }
 0x544   : > { %4177 = vst.msk [vmem:[%s5540_s17 + $0x28] sm:$0xff] %vm561_vm0, %v4161_v53  ;;  %v4094_v58 = vadd.f32 %v5977_v1, %v4093_v56  ;;  %v5119_v0 = vpop.f32.mrb[26].mxu1 }
 0x545   : > { %v4150_v26 = vadd.f32 %v4134_v54, %v4102_v55  ;;  %v4105_v2 = vadd.f32 %v5119_v0, %v5977_v1  ;;  %v4096_v60 = vpop.f32.mrb[27].mxu1 }
 0x546   : > { %v4148_v5 = vadd.f32 %v4132_v57, %v4094_v58  ;;  %v4097_v6 = vadd.f32 %v5977_v1, %v4096_v60 }
 0x547   : > { %v4166_v7 = vmax.f32 %v4150_v26, 0.0  ;;  %v4151_v8 = vadd.f32 %v4135_v59, %v4105_v2 }
 0x548   : > { %v4164_v61 = vmax.f32 %v4148_v5, 0.0  ;;  %v4149_v62 = vadd.f32 %v4133_v4, %v4097_v6 }
 0x549   : > { %4182 = vst.msk [vmem:[%s5540_s17 + $0x50] sm:$0xff] %vm561_vm0, %v4166_v7  ;;  %v4167_v9 = vmax.f32 %v4151_v8, 0.0 }
 0x54a   : > { %4180 = vst.msk [vmem:[%s5540_s17 + $0x40] sm:$0xff] %vm561_vm0, %v4164_v61  ;;  %v4165_v10 = vmax.f32 %v4149_v62, 0.0  ;;  %v5122_v11 = vpop.f32.mrb[28].mxu1 }
 0x54b   : > { %4183 = vst.msk [vmem:[%s5540_s17 + $0x58] sm:$0xff] %vm561_vm0, %v4167_v9  ;;  %v4118_v63 = vadd.f32 %v5122_v11, %v5977_v1  ;;  %v4109_v13 = vpop.f32.mrb[29].mxu1 }
 0x54c   : > { %4181 = vst.msk [vmem:[%s5540_s17 + $0x48] sm:$0xff] %vm561_vm0, %v4165_v10  ;;  %v4110_v15 = vadd.f32 %v5977_v1, %v4109_v13  ;;  %v5123_v3 = vpop.f32.mrb[30].mxu1 }
 0x54d   : > { %v4154_v18 = vadd.f32 %v4138_v12, %v4118_v63  ;;  %v4121_v19 = vadd.f32 %v5123_v3, %v5977_v1  ;;  %v4112_v20 = vpop.f32.mrb[31].mxu1 }
 0x54e   : > { %v4152_v22 = vadd.f32 %v4136_v14, %v4110_v15  ;;  %v4113_v23 = vadd.f32 %v5977_v1, %v4112_v20 }
 0x54f   : > { %v4170_v24 = vmax.f32 %v4154_v18, 0.0  ;;  %v4155_v16 = vadd.f32 %v4139_v17, %v4121_v19 }
 0x550   : > { %v4168_v25 = vmax.f32 %v4152_v22, 0.0  ;;  %v4153_v29 = vadd.f32 %v4137_v21, %v4113_v23 }
 0x551   : > { %4186 = vst.msk [vmem:[%s5540_s17 + $0x70] sm:$0xff] %vm561_vm0, %v4170_v24  ;;  %v4171_v30 = vmax.f32 %v4155_v16, 0.0 }
 0x552   : > { %4184 = vst.msk [vmem:[%s5540_s17 + $0x60] sm:$0xff] %vm561_vm0, %v4168_v25  ;;  %v4169_v31 = vmax.f32 %v4153_v29, 0.0 }
 0x553   : > { %4187 = vst.msk [vmem:[%s5540_s17 + $0x78] sm:$0xff] %vm561_vm0, %v4171_v30 }
 0x554   : > { %4185 = vst.msk [vmem:[%s5540_s17 + $0x68] sm:$0xff] %vm561_vm0, %v4169_v31 }
 0x555 PF: > { %s19_s13 = sadd.s32 1, %s5420_s13   ;;  %s6069_s30 = smov %s5412_s11 }
 0x556   : > { %p16_p0 = scmp.ge.s32.totalorder %s19_s13, 6   ;;  %s6070_s10 = smov %s5416_s12 }
 0x557   : > { %s6071_s11 = smov %s6074_s14  ;;  %s6072_s12 = smov %s6078_s15 }
 0x558   :  { %18 = sbr.rel (!%p16_p0) target bundleno = 3 (0x3), region = 120 }

</bundles_post_ra>
